<compile_context>
chip_gen: v7x
topology: tpu7x:2x2x1
jax: 0.10.0
libtpu: 0.0.40
codegen_flags: <defaults>
</compile_context>

<pallas_src>
import jax
import jax.numpy as jnp
import numpy as np
from jax.experimental import pallas as pl
from jax.experimental.pallas import tpu as pltpu

C_LANES = 128  # lane tile: (batch*channel) values mapped onto the 128 lanes


def _dwconv5x5_kernel(x_ref, w_ref, o_ref):
    # x_ref: (H+4, W+4, Ct)  spatially pre-padded input, (batch*chan) on lanes
    # w_ref: (25, Ct)        reparam'd 5x5 taps, one per-lane weight per tap
    # o_ref: (H, W, Ct)      output slab
    H, W, Ct = o_ref.shape
    TH = H if H <= 8 else 8          # output rows per register-resident tile
    n_tiles = pl.cdiv(H, TH)

    w = w_ref[...].astype(jnp.float32)          # (25, Ct), ~4 vregs

    def tap(k):                                  # (1, Ct): broadcast over tile
        return w[k:k + 1, :]

    def tile_body(t, carry):
        # Clamp the last (possibly partial) tile; overlap rows are recomputed.
        r0 = jnp.minimum(t * TH, H - TH)
        acc_a = jnp.zeros((TH, W, Ct), jnp.float32)
        acc_b = jnp.zeros((TH, W, Ct), jnp.float32)
        for j in range(5):
            # One sublane-realigned load per column shift j; the five row
            # shifts below are free leading-dim slices of this value.
            xj = x_ref[pl.ds(r0, TH + 4), pl.ds(j, W), :].astype(jnp.float32)
            pj = (xj[0:TH] * tap(j)
                  + xj[1:TH + 1] * tap(5 + j)
                  + xj[2:TH + 2] * tap(10 + j)
                  + xj[3:TH + 3] * tap(15 + j)
                  + xj[4:TH + 4] * tap(20 + j))
            if j % 2 == 0:
                acc_a = acc_a + pj
            else:
                acc_b = acc_b + pj
        o_ref[pl.ds(r0, TH), :, :] = (acc_a + acc_b).astype(o_ref.dtype)
        return carry

    jax.lax.fori_loop(0, n_tiles, tile_body, 0)


def _reparam_weight_table(w1x1, w3x3, w5x5, alpha):
    """PyTorch reparam_5x5 -> (25, C) per-lane f32 weight table."""
    C = w1x1.shape[0]
    pad1x1 = jnp.pad(w1x1, ((0, 0), (0, 0), (2, 2), (2, 2)))
    pad3x3 = jnp.pad(w3x3, ((0, 0), (0, 0), (1, 1), (1, 1)))
    identity = jnp.pad(jnp.ones_like(w1x1), ((0, 0), (0, 0), (2, 2), (2, 2)))
    combined = (alpha[0] * identity + alpha[1] * pad1x1
                + alpha[2] * pad3x3 + alpha[3] * w5x5)            # (C,1,5,5)
    return jnp.transpose(combined.reshape(C, 25)).astype(jnp.float32)  # (25,C)


@jax.jit
def omnishift_forward(x, w1x1, w3x3, w5x5, alpha):
    """x: (N, C, H, W); weights in PyTorch depthwise layout:
       w1x1 (C,1,1,1), w3x3 (C,1,3,3), w5x5 (C,1,5,5), alpha (4,)."""
    N, C, H, W = x.shape
    NC = N * C
    NCp = ((NC + C_LANES - 1) // C_LANES) * C_LANES

    # Reparam'd weight table, replicated per batch element on the lane axis.
    w_tab = _reparam_weight_table(w1x1, w3x3, w5x5, alpha)       # (25, C)
    w_tab = jnp.tile(w_tab, (1, N))                              # (25, N*C)
    w_tab = jnp.pad(w_tab, ((0, 0), (0, NCp - NC)))              # (25, NCp)

    # Layout plumbing (single fused XLA pass): NCHW -> (H, W, N*C) with the
    # conv's spatial zero halo and the lane padding folded into one jnp.pad.
    x_hwl = jnp.transpose(x, (2, 3, 0, 1)).reshape(H, W, NC)
    x_pad = jnp.pad(x_hwl, ((2, 2), (2, 2), (0, NCp - NC)))      # (H+4,W+4,NCp)

    # Scoped-VMEM limit sized to the actual (double-buffered) blocks.
    itemsize = jnp.dtype(x.dtype).itemsize
    in_blk = (H + 4) * (W + 4) * C_LANES * itemsize
    out_blk = H * W * C_LANES * itemsize
    w_blk = 25 * C_LANES * 4
    vmem_limit = int(min(max(2 * (in_blk + out_blk + w_blk) + (2 << 20),
                             4 << 20), 64 << 20))

    grid = (NCp // C_LANES,)
    grid_spec = pltpu.PrefetchScalarGridSpec(
        num_scalar_prefetch=0,
        grid=grid,
        in_specs=[
            pl.BlockSpec((H + 4, W + 4, C_LANES), lambda ct: (0, 0, ct)),
            pl.BlockSpec((25, C_LANES), lambda ct: (0, ct)),
        ],
        out_specs=pl.BlockSpec((H, W, C_LANES), lambda ct: (0, 0, ct)),
    )

    out_hwl = pl.pallas_call(
        _dwconv5x5_kernel,
        out_shape=jax.ShapeDtypeStruct((H, W, NCp), x.dtype),
        grid_spec=grid_spec,
        compiler_params=pltpu.CompilerParams(
            dimension_semantics=("parallel",),
            vmem_limit_bytes=vmem_limit),
    )(x_pad, w_tab)

    # Drop lane padding, back to NCHW.
    out = out_hwl[:, :, :NC].reshape(H, W, N, C)
    return jnp.transpose(out, (2, 3, 0, 1))


def _reference(x, w1x1, w3x3, w5x5, alpha):
    """Pure-JAX reference: reparam + depthwise 5x5 conv via lax.conv."""
    C = x.shape[1]
    pad1x1 = jnp.pad(w1x1, ((0, 0), (0, 0), (2, 2), (2, 2)))
    pad3x3 = jnp.pad(w3x3, ((0, 0), (0, 0), (1, 1), (1, 1)))
    identity = jnp.pad(jnp.ones_like(w1x1), ((0, 0), (0, 0), (2, 2), (2, 2)))
    combined = (alpha[0] * identity + alpha[1] * pad1x1
                + alpha[2] * pad3x3 + alpha[3] * w5x5)            # (C,1,5,5)
    return jax.lax.conv_general_dilated(
        x, combined, window_strides=(1, 1), padding=((2, 2), (2, 2)),
        dimension_numbers=("NCHW", "OIHW", "NCHW"),
        feature_group_count=C)


if __name__ == "__main__":
    key = jax.random.PRNGKey(0)
    k_x, k1, k3, k5, ka = jax.random.split(key, 5)

    N, C, H, W = 2, 4, 16, 16
    x = jax.random.normal(k_x, (N, C, H, W), dtype=jnp.float32)

    # Deterministic "randn"-style params (shapes from nn.Conv2d groups=dim).
    w1x1 = jax.random.normal(k1, (C, 1, 1, 1), dtype=jnp.float32)
    w3x3 = jax.random.normal(k3, (C, 1, 3, 3), dtype=jnp.float32)
    w5x5 = jax.random.normal(k5, (C, 1, 5, 5), dtype=jnp.float32)
    alpha = jax.random.normal(ka, (4,), dtype=jnp.float32)

    out = jax.block_until_ready(omnishift_forward(x, w1x1, w3x3, w5x5, alpha))
    ref = jax.block_until_ready(_reference(x, w1x1, w3x3, w5x5, alpha))

    assert out.shape == (N, C, H, W)
    np.testing.assert_allclose(np.asarray(out), np.asarray(ref),
                               rtol=1e-5, atol=1e-5)

    print("KERNEL_OK")
</pallas_src>

<mosaic_0001>
module attributes {stable_mosaic.version = 11 : i64} {
  func.func @_dwconv5x5_kernel(%arg0: i32, %arg1: memref<20x20x128xf32, #tpu.memory_space<vmem>>, %arg2: memref<25x128xf32, #tpu.memory_space<vmem>>, %arg3: memref<16x16x128xf32, #tpu.memory_space<vmem>>) attributes {dimension_semantics = [#tpu.dimension_semantics<parallel>], iteration_bounds = array<i64: 1>, scalar_prefetch = 0 : i64, scratch_operands = 0 : i64, tpu.core_type = #tpu.core_type<tc>, window_params = [{transform_indices = @transform_0, window_bounds = array<i64: 20, 20, 128>}, {transform_indices = @transform_1, window_bounds = array<i64: 25, 128>}, {transform_indices = @transform_2, window_bounds = array<i64: 16, 16, 128>}]} {
    %c0 = arith.constant 0 : index
    %c0_0 = arith.constant 0 : index
    %0 = vector.load %arg2[%c0, %c0_0] : memref<25x128xf32, #tpu.memory_space<vmem>>, vector<25x128xf32>
    %c0_i32 = arith.constant 0 : i32
    %c2_i32 = arith.constant 2 : i32
    %1 = arith.addi %c0_i32, %c2_i32 : i32
    %c1_i32 = arith.constant 1 : i32
    scf.for %arg4 = %c0_i32 to %1 step %c1_i32  : i32 {
      %c8_i32 = arith.constant 8 : i32
      %2 = arith.muli %arg4, %c8_i32 : i32
      %c8_i32_2 = arith.constant 8 : i32
      %3 = arith.minsi %2, %c8_i32_2 : i32
      %cst = arith.constant 0.000000e+00 : f32
      %4 = vector.broadcast %cst : f32 to vector<8x16x128xf32>
      %cst_3 = arith.constant 0.000000e+00 : f32
      %5 = vector.broadcast %cst_3 : f32 to vector<8x16x128xf32>
      %6 = arith.index_cast %3 : i32 to index
      %c0_4 = arith.constant 0 : index
      %c0_5 = arith.constant 0 : index
      %7 = vector.load %arg1[%6, %c0_4, %c0_5] : memref<20x20x128xf32, #tpu.memory_space<vmem>>, vector<12x16x128xf32>
      %8 = vector.extract_strided_slice %7 {offsets = [0, 0, 0], sizes = [8, 16, 128], strides = [1, 1, 1]} : vector<12x16x128xf32> to vector<8x16x128xf32>
      %9 = vector.extract_strided_slice %0 {offsets = [0, 0], sizes = [1, 128], strides = [1, 1]} : vector<25x128xf32> to vector<1x128xf32>
      %10 = vector.shape_cast %9 : vector<1x128xf32> to vector<1x1x128xf32>
      %11 = vector.broadcast %10 : vector<1x1x128xf32> to vector<8x16x128xf32>
      %12 = arith.mulf %8, %11 : vector<8x16x128xf32>
      %13 = vector.extract_strided_slice %7 {offsets = [1, 0, 0], sizes = [8, 16, 128], strides = [1, 1, 1]} : vector<12x16x128xf32> to vector<8x16x128xf32>
      %14 = vector.extract_strided_slice %0 {offsets = [5, 0], sizes = [1, 128], strides = [1, 1]} : vector<25x128xf32> to vector<1x128xf32>
      %15 = vector.shape_cast %14 : vector<1x128xf32> to vector<1x1x128xf32>
      %16 = vector.broadcast %15 : vector<1x1x128xf32> to vector<8x16x128xf32>
      %17 = arith.mulf %13, %16 : vector<8x16x128xf32>
      %18 = arith.addf %12, %17 : vector<8x16x128xf32>
      %19 = vector.extract_strided_slice %7 {offsets = [2, 0, 0], sizes = [8, 16, 128], strides = [1, 1, 1]} : vector<12x16x128xf32> to vector<8x16x128xf32>
      %20 = vector.extract_strided_slice %0 {offsets = [10, 0], sizes = [1, 128], strides = [1, 1]} : vector<25x128xf32> to vector<1x128xf32>
      %21 = vector.shape_cast %20 : vector<1x128xf32> to vector<1x1x128xf32>
      %22 = vector.broadcast %21 : vector<1x1x128xf32> to vector<8x16x128xf32>
      %23 = arith.mulf %19, %22 : vector<8x16x128xf32>
      %24 = arith.addf %18, %23 : vector<8x16x128xf32>
      %25 = vector.extract_strided_slice %7 {offsets = [3, 0, 0], sizes = [8, 16, 128], strides = [1, 1, 1]} : vector<12x16x128xf32> to vector<8x16x128xf32>
      %26 = vector.extract_strided_slice %0 {offsets = [15, 0], sizes = [1, 128], strides = [1, 1]} : vector<25x128xf32> to vector<1x128xf32>
      %27 = vector.shape_cast %26 : vector<1x128xf32> to vector<1x1x128xf32>
      %28 = vector.broadcast %27 : vector<1x1x128xf32> to vector<8x16x128xf32>
      %29 = arith.mulf %25, %28 : vector<8x16x128xf32>
      %30 = arith.addf %24, %29 : vector<8x16x128xf32>
      %31 = vector.extract_strided_slice %7 {offsets = [4, 0, 0], sizes = [8, 16, 128], strides = [1, 1, 1]} : vector<12x16x128xf32> to vector<8x16x128xf32>
      %32 = vector.extract_strided_slice %0 {offsets = [20, 0], sizes = [1, 128], strides = [1, 1]} : vector<25x128xf32> to vector<1x128xf32>
      %33 = vector.shape_cast %32 : vector<1x128xf32> to vector<1x1x128xf32>
      %34 = vector.broadcast %33 : vector<1x1x128xf32> to vector<8x16x128xf32>
      %35 = arith.mulf %31, %34 : vector<8x16x128xf32>
      %36 = arith.addf %30, %35 : vector<8x16x128xf32>
      %37 = arith.addf %4, %36 : vector<8x16x128xf32>
      %38 = arith.index_cast %3 : i32 to index
      %c1 = arith.constant 1 : index
      %c0_6 = arith.constant 0 : index
      %39 = vector.load %arg1[%38, %c1, %c0_6] : memref<20x20x128xf32, #tpu.memory_space<vmem>>, vector<12x16x128xf32>
      %40 = vector.extract_strided_slice %39 {offsets = [0, 0, 0], sizes = [8, 16, 128], strides = [1, 1, 1]} : vector<12x16x128xf32> to vector<8x16x128xf32>
      %41 = vector.extract_strided_slice %0 {offsets = [1, 0], sizes = [1, 128], strides = [1, 1]} : vector<25x128xf32> to vector<1x128xf32>
      %42 = vector.shape_cast %41 : vector<1x128xf32> to vector<1x1x128xf32>
      %43 = vector.broadcast %42 : vector<1x1x128xf32> to vector<8x16x128xf32>
      %44 = arith.mulf %40, %43 : vector<8x16x128xf32>
      %45 = vector.extract_strided_slice %39 {offsets = [1, 0, 0], sizes = [8, 16, 128], strides = [1, 1, 1]} : vector<12x16x128xf32> to vector<8x16x128xf32>
      %46 = vector.extract_strided_slice %0 {offsets = [6, 0], sizes = [1, 128], strides = [1, 1]} : vector<25x128xf32> to vector<1x128xf32>
      %47 = vector.shape_cast %46 : vector<1x128xf32> to vector<1x1x128xf32>
      %48 = vector.broadcast %47 : vector<1x1x128xf32> to vector<8x16x128xf32>
      %49 = arith.mulf %45, %48 : vector<8x16x128xf32>
      %50 = arith.addf %44, %49 : vector<8x16x128xf32>
      %51 = vector.extract_strided_slice %39 {offsets = [2, 0, 0], sizes = [8, 16, 128], strides = [1, 1, 1]} : vector<12x16x128xf32> to vector<8x16x128xf32>
      %52 = vector.extract_strided_slice %0 {offsets = [11, 0], sizes = [1, 128], strides = [1, 1]} : vector<25x128xf32> to vector<1x128xf32>
      %53 = vector.shape_cast %52 : vector<1x128xf32> to vector<1x1x128xf32>
      %54 = vector.broadcast %53 : vector<1x1x128xf32> to vector<8x16x128xf32>
      %55 = arith.mulf %51, %54 : vector<8x16x128xf32>
      %56 = arith.addf %50, %55 : vector<8x16x128xf32>
      %57 = vector.extract_strided_slice %39 {offsets = [3, 0, 0], sizes = [8, 16, 128], strides = [1, 1, 1]} : vector<12x16x128xf32> to vector<8x16x128xf32>
      %58 = vector.extract_strided_slice %0 {offsets = [16, 0], sizes = [1, 128], strides = [1, 1]} : vector<25x128xf32> to vector<1x128xf32>
      %59 = vector.shape_cast %58 : vector<1x128xf32> to vector<1x1x128xf32>
      %60 = vector.broadcast %59 : vector<1x1x128xf32> to vector<8x16x128xf32>
      %61 = arith.mulf %57, %60 : vector<8x16x128xf32>
      %62 = arith.addf %56, %61 : vector<8x16x128xf32>
      %63 = vector.extract_strided_slice %39 {offsets = [4, 0, 0], sizes = [8, 16, 128], strides = [1, 1, 1]} : vector<12x16x128xf32> to vector<8x16x128xf32>
      %64 = vector.extract_strided_slice %0 {offsets = [21, 0], sizes = [1, 128], strides = [1, 1]} : vector<25x128xf32> to vector<1x128xf32>
      %65 = vector.shape_cast %64 : vector<1x128xf32> to vector<1x1x128xf32>
      %66 = vector.broadcast %65 : vector<1x1x128xf32> to vector<8x16x128xf32>
      %67 = arith.mulf %63, %66 : vector<8x16x128xf32>
      %68 = arith.addf %62, %67 : vector<8x16x128xf32>
      %69 = arith.addf %5, %68 : vector<8x16x128xf32>
      %70 = arith.index_cast %3 : i32 to index
      %c2 = arith.constant 2 : index
      %c0_7 = arith.constant 0 : index
      %71 = vector.load %arg1[%70, %c2, %c0_7] : memref<20x20x128xf32, #tpu.memory_space<vmem>>, vector<12x16x128xf32>
      %72 = vector.extract_strided_slice %71 {offsets = [0, 0, 0], sizes = [8, 16, 128], strides = [1, 1, 1]} : vector<12x16x128xf32> to vector<8x16x128xf32>
      %73 = vector.extract_strided_slice %0 {offsets = [2, 0], sizes = [1, 128], strides = [1, 1]} : vector<25x128xf32> to vector<1x128xf32>
      %74 = vector.shape_cast %73 : vector<1x128xf32> to vector<1x1x128xf32>
      %75 = vector.broadcast %74 : vector<1x1x128xf32> to vector<8x16x128xf32>
      %76 = arith.mulf %72, %75 : vector<8x16x128xf32>
      %77 = vector.extract_strided_slice %71 {offsets = [1, 0, 0], sizes = [8, 16, 128], strides = [1, 1, 1]} : vector<12x16x128xf32> to vector<8x16x128xf32>
      %78 = vector.extract_strided_slice %0 {offsets = [7, 0], sizes = [1, 128], strides = [1, 1]} : vector<25x128xf32> to vector<1x128xf32>
      %79 = vector.shape_cast %78 : vector<1x128xf32> to vector<1x1x128xf32>
      %80 = vector.broadcast %79 : vector<1x1x128xf32> to vector<8x16x128xf32>
      %81 = arith.mulf %77, %80 : vector<8x16x128xf32>
      %82 = arith.addf %76, %81 : vector<8x16x128xf32>
      %83 = vector.extract_strided_slice %71 {offsets = [2, 0, 0], sizes = [8, 16, 128], strides = [1, 1, 1]} : vector<12x16x128xf32> to vector<8x16x128xf32>
      %84 = vector.extract_strided_slice %0 {offsets = [12, 0], sizes = [1, 128], strides = [1, 1]} : vector<25x128xf32> to vector<1x128xf32>
      %85 = vector.shape_cast %84 : vector<1x128xf32> to vector<1x1x128xf32>
      %86 = vector.broadcast %85 : vector<1x1x128xf32> to vector<8x16x128xf32>
      %87 = arith.mulf %83, %86 : vector<8x16x128xf32>
      %88 = arith.addf %82, %87 : vector<8x16x128xf32>
      %89 = vector.extract_strided_slice %71 {offsets = [3, 0, 0], sizes = [8, 16, 128], strides = [1, 1, 1]} : vector<12x16x128xf32> to vector<8x16x128xf32>
      %90 = vector.extract_strided_slice %0 {offsets = [17, 0], sizes = [1, 128], strides = [1, 1]} : vector<25x128xf32> to vector<1x128xf32>
      %91 = vector.shape_cast %90 : vector<1x128xf32> to vector<1x1x128xf32>
      %92 = vector.broadcast %91 : vector<1x1x128xf32> to vector<8x16x128xf32>
      %93 = arith.mulf %89, %92 : vector<8x16x128xf32>
      %94 = arith.addf %88, %93 : vector<8x16x128xf32>
      %95 = vector.extract_strided_slice %71 {offsets = [4, 0, 0], sizes = [8, 16, 128], strides = [1, 1, 1]} : vector<12x16x128xf32> to vector<8x16x128xf32>
      %96 = vector.extract_strided_slice %0 {offsets = [22, 0], sizes = [1, 128], strides = [1, 1]} : vector<25x128xf32> to vector<1x128xf32>
      %97 = vector.shape_cast %96 : vector<1x128xf32> to vector<1x1x128xf32>
      %98 = vector.broadcast %97 : vector<1x1x128xf32> to vector<8x16x128xf32>
      %99 = arith.mulf %95, %98 : vector<8x16x128xf32>
      %100 = arith.addf %94, %99 : vector<8x16x128xf32>
      %101 = arith.addf %37, %100 : vector<8x16x128xf32>
      %102 = arith.index_cast %3 : i32 to index
      %c3 = arith.constant 3 : index
      %c0_8 = arith.constant 0 : index
      %103 = vector.load %arg1[%102, %c3, %c0_8] : memref<20x20x128xf32, #tpu.memory_space<vmem>>, vector<12x16x128xf32>
      %104 = vector.extract_strided_slice %103 {offsets = [0, 0, 0], sizes = [8, 16, 128], strides = [1, 1, 1]} : vector<12x16x128xf32> to vector<8x16x128xf32>
      %105 = vector.extract_strided_slice %0 {offsets = [3, 0], sizes = [1, 128], strides = [1, 1]} : vector<25x128xf32> to vector<1x128xf32>
      %106 = vector.shape_cast %105 : vector<1x128xf32> to vector<1x1x128xf32>
      %107 = vector.broadcast %106 : vector<1x1x128xf32> to vector<8x16x128xf32>
      %108 = arith.mulf %104, %107 : vector<8x16x128xf32>
      %109 = vector.extract_strided_slice %103 {offsets = [1, 0, 0], sizes = [8, 16, 128], strides = [1, 1, 1]} : vector<12x16x128xf32> to vector<8x16x128xf32>
      %110 = vector.extract_strided_slice %0 {offsets = [8, 0], sizes = [1, 128], strides = [1, 1]} : vector<25x128xf32> to vector<1x128xf32>
      %111 = vector.shape_cast %110 : vector<1x128xf32> to vector<1x1x128xf32>
      %112 = vector.broadcast %111 : vector<1x1x128xf32> to vector<8x16x128xf32>
      %113 = arith.mulf %109, %112 : vector<8x16x128xf32>
      %114 = arith.addf %108, %113 : vector<8x16x128xf32>
      %115 = vector.extract_strided_slice %103 {offsets = [2, 0, 0], sizes = [8, 16, 128], strides = [1, 1, 1]} : vector<12x16x128xf32> to vector<8x16x128xf32>
      %116 = vector.extract_strided_slice %0 {offsets = [13, 0], sizes = [1, 128], strides = [1, 1]} : vector<25x128xf32> to vector<1x128xf32>
      %117 = vector.shape_cast %116 : vector<1x128xf32> to vector<1x1x128xf32>
      %118 = vector.broadcast %117 : vector<1x1x128xf32> to vector<8x16x128xf32>
      %119 = arith.mulf %115, %118 : vector<8x16x128xf32>
      %120 = arith.addf %114, %119 : vector<8x16x128xf32>
      %121 = vector.extract_strided_slice %103 {offsets = [3, 0, 0], sizes = [8, 16, 128], strides = [1, 1, 1]} : vector<12x16x128xf32> to vector<8x16x128xf32>
      %122 = vector.extract_strided_slice %0 {offsets = [18, 0], sizes = [1, 128], strides = [1, 1]} : vector<25x128xf32> to vector<1x128xf32>
      %123 = vector.shape_cast %122 : vector<1x128xf32> to vector<1x1x128xf32>
      %124 = vector.broadcast %123 : vector<1x1x128xf32> to vector<8x16x128xf32>
      %125 = arith.mulf %121, %124 : vector<8x16x128xf32>
      %126 = arith.addf %120, %125 : vector<8x16x128xf32>
      %127 = vector.extract_strided_slice %103 {offsets = [4, 0, 0], sizes = [8, 16, 128], strides = [1, 1, 1]} : vector<12x16x128xf32> to vector<8x16x128xf32>
      %128 = vector.extract_strided_slice %0 {offsets = [23, 0], sizes = [1, 128], strides = [1, 1]} : vector<25x128xf32> to vector<1x128xf32>
      %129 = vector.shape_cast %128 : vector<1x128xf32> to vector<1x1x128xf32>
      %130 = vector.broadcast %129 : vector<1x1x128xf32> to vector<8x16x128xf32>
      %131 = arith.mulf %127, %130 : vector<8x16x128xf32>
      %132 = arith.addf %126, %131 : vector<8x16x128xf32>
      %133 = arith.addf %69, %132 : vector<8x16x128xf32>
      %134 = arith.index_cast %3 : i32 to index
      %c4 = arith.constant 4 : index
      %c0_9 = arith.constant 0 : index
      %135 = vector.load %arg1[%134, %c4, %c0_9] : memref<20x20x128xf32, #tpu.memory_space<vmem>>, vector<12x16x128xf32>
      %136 = vector.extract_strided_slice %135 {offsets = [0, 0, 0], sizes = [8, 16, 128], strides = [1, 1, 1]} : vector<12x16x128xf32> to vector<8x16x128xf32>
      %137 = vector.extract_strided_slice %0 {offsets = [4, 0], sizes = [1, 128], strides = [1, 1]} : vector<25x128xf32> to vector<1x128xf32>
      %138 = vector.shape_cast %137 : vector<1x128xf32> to vector<1x1x128xf32>
      %139 = vector.broadcast %138 : vector<1x1x128xf32> to vector<8x16x128xf32>
      %140 = arith.mulf %136, %139 : vector<8x16x128xf32>
      %141 = vector.extract_strided_slice %135 {offsets = [1, 0, 0], sizes = [8, 16, 128], strides = [1, 1, 1]} : vector<12x16x128xf32> to vector<8x16x128xf32>
      %142 = vector.extract_strided_slice %0 {offsets = [9, 0], sizes = [1, 128], strides = [1, 1]} : vector<25x128xf32> to vector<1x128xf32>
      %143 = vector.shape_cast %142 : vector<1x128xf32> to vector<1x1x128xf32>
      %144 = vector.broadcast %143 : vector<1x1x128xf32> to vector<8x16x128xf32>
      %145 = arith.mulf %141, %144 : vector<8x16x128xf32>
      %146 = arith.addf %140, %145 : vector<8x16x128xf32>
      %147 = vector.extract_strided_slice %135 {offsets = [2, 0, 0], sizes = [8, 16, 128], strides = [1, 1, 1]} : vector<12x16x128xf32> to vector<8x16x128xf32>
      %148 = vector.extract_strided_slice %0 {offsets = [14, 0], sizes = [1, 128], strides = [1, 1]} : vector<25x128xf32> to vector<1x128xf32>
      %149 = vector.shape_cast %148 : vector<1x128xf32> to vector<1x1x128xf32>
      %150 = vector.broadcast %149 : vector<1x1x128xf32> to vector<8x16x128xf32>
      %151 = arith.mulf %147, %150 : vector<8x16x128xf32>
      %152 = arith.addf %146, %151 : vector<8x16x128xf32>
      %153 = vector.extract_strided_slice %135 {offsets = [3, 0, 0], sizes = [8, 16, 128], strides = [1, 1, 1]} : vector<12x16x128xf32> to vector<8x16x128xf32>
      %154 = vector.extract_strided_slice %0 {offsets = [19, 0], sizes = [1, 128], strides = [1, 1]} : vector<25x128xf32> to vector<1x128xf32>
      %155 = vector.shape_cast %154 : vector<1x128xf32> to vector<1x1x128xf32>
      %156 = vector.broadcast %155 : vector<1x1x128xf32> to vector<8x16x128xf32>
      %157 = arith.mulf %153, %156 : vector<8x16x128xf32>
      %158 = arith.addf %152, %157 : vector<8x16x128xf32>
      %159 = vector.extract_strided_slice %135 {offsets = [4, 0, 0], sizes = [8, 16, 128], strides = [1, 1, 1]} : vector<12x16x128xf32> to vector<8x16x128xf32>
      %160 = vector.extract_strided_slice %0 {offsets = [24, 0], sizes = [1, 128], strides = [1, 1]} : vector<25x128xf32> to vector<1x128xf32>
      %161 = vector.shape_cast %160 : vector<1x128xf32> to vector<1x1x128xf32>
      %162 = vector.broadcast %161 : vector<1x1x128xf32> to vector<8x16x128xf32>
      %163 = arith.mulf %159, %162 : vector<8x16x128xf32>
      %164 = arith.addf %158, %163 : vector<8x16x128xf32>
      %165 = arith.addf %101, %164 : vector<8x16x128xf32>
      %166 = arith.addf %165, %133 : vector<8x16x128xf32>
      %167 = arith.index_cast %3 : i32 to index
      %c0_10 = arith.constant 0 : index
      %c0_11 = arith.constant 0 : index
      %168 = vector.load %arg3[%167, %c0_10, %c0_11] : memref<16x16x128xf32, #tpu.memory_space<vmem>>, vector<8x16x128xf32>
      tpu.vector_store %arg3[%167, %c0_10, %c0_11], %166 {strides = array<i32>} : memref<16x16x128xf32, #tpu.memory_space<vmem>>, vector<8x16x128xf32>,
    }
    %c2_i32_1 = arith.constant 2 : i32
    return
  }
  func.func @transform_0(%arg0: i32) -> (i32, i32, i32) {
    %c0_i32 = arith.constant 0 : i32
    %c0_i32_0 = arith.constant 0 : i32
    %c0_i32_1 = arith.constant 0 : i32
    return %c0_i32, %c0_i32_0, %arg0 : i32, i32, i32
  }
  func.func @transform_1(%arg0: i32) -> (i32, i32) {
    %c0_i32 = arith.constant 0 : i32
    %c0_i32_0 = arith.constant 0 : i32
    return %c0_i32, %arg0 : i32, i32
  }
  func.func @transform_2(%arg0: i32) -> (i32, i32, i32) {
    %c0_i32 = arith.constant 0 : i32
    %c0_i32_0 = arith.constant 0 : i32
    %c0_i32_1 = arith.constant 0 : i32
    return %c0_i32, %c0_i32_0, %arg0 : i32, i32, i32
  }
}

</mosaic_0001>

<bundles_post_ra>
// kernel: omnishift_forward.1
= control target key start
LH: loop header
LB: loop body
LE: loop exit
PB: predicated region body
PF: predicated region fallthrough
CT: control target
= control target key end

     0   :  { %s1147_s17 = smov 0   ;;  %s2363_s0 = inlined_call_operand.vmem [shape: f32[20,20,128], index: 0, kind: input, shape index: {}]   ;;  %s2364_s1 = inlined_call_operand.vmem [shape: f32[25,128], index: 1, kind: input, shape index: {}]   ;;  %s2365_s2 = inlined_call_operand.vmem [shape: f32[16,16,128], index: 2, kind: output, shape index: {}]  }
   0x1   :  { %v1130_v0 = vld [vmem:[%s2364_s1] sm:$0xff]  ;;  %v1135_v1 = vld [vmem:[%s2364_s1 + $0x8] sm:$0xff]  ;;  %v1140_v2 = vld [vmem:[%s2364_s1 + $0x10] sm:$0xff] }
   0x2   :  { %2531 = vst [vmem:[#allocation2_spill] sm:$0xff] %v1130_v0  ;;  %2532 = vst [vmem:[#allocation3_spill] sm:$0xff] %v1135_v1  ;;  %v1145_v3 = vld [vmem:[%s2364_s1 + $0x18] ss:$0 sm:$0xff] }
   0x3   :  { %2533 = vst [vmem:[#allocation4_spill] sm:$0xff] %v1140_v2 }
   0x4 LB: > { %v50_v4 = vlaneseq  ;;  %s1093_s18 = sshll.u32 %s1110_s17, 3  ;;  %s20_s17 = sadd.s32 1, %s1110_s17   ;;  %s1110_s17 = sphi %s1147_s17, %s20_s17  }
   0x5   : > { %p22_p0 = scmp.lt.s32.totalorder %s1093_s18, 8  ;;  %p17_p1 = scmp.ge.s32.totalorder %s20_s17, 2  }
   0x6   : > { %v51_v5 = vshrl.u32 %v50_v4, 7 }
   0x7   : > { %s2814_s18 = smov (!%p22_p0, %s1093_s18), 8 }
   0x8   : > { %v52_v6 = vsub.s32 0, %v51_v5  ;;  %v72_v7 = vsub.s32 5, %v51_v5  ;;  %v108_v8 = vsub.s32 2, %v51_v5  ;;  %v144_v9 = vsub.s32 7, %v51_v5  ;;  %s24_s1 = smul.u32 24, %s2814_s18  ;;  %s1095_s22 = sshll.u32 %s2814_s18, 4 }
   0x9   : > { %v2535_v1 = vld [vmem:[#allocation3_spill] sm:$0xff]  ;;  %v2536_v0 = vld [vmem:[#allocation2_spill] sm:$0xff]  ;;  %v180_v10 = vsub.s32 4, %v51_v5  ;;  %v256_v11 = vsub.s32 1, %v51_v5  ;;  %v276_v12 = vsub.s32 6, %v51_v5  ;;  %v1164_v16 = vsub.s32 3, %v51_v5  ;;  %s1435_s25 = scalar_lea.vmem %s2365_s2, %s1095_s22 }
   0xa   : > { %v2534_v2 = vld [vmem:[#allocation4_spill] sm:$0xff]  ;;  %v1156_v13 = vrot.slane %v2536_v0, %v52_v6  ;;  %v1159_v14 = vrot.slane %v2536_v0, %v72_v7  ;;  %v1162_v15 = vrot.slane %v2535_v1, %v108_v8  ;;  %v1168_v17 = vrot.slane %v2535_v1, %v144_v9  ;;  %s1195_s21 = scalar_lea.vmem %s2363_s0, %s24_s1 }
   0xb   : > { %v1171_v18 = vrot.slane %v2534_v2, %v180_v10  ;;  %v1174_v19 = vrot.slane %v2536_v0, %v256_v11  ;;  %v1177_v20 = vrot.slane %v2536_v0, %v276_v12  ;;  %v1181_v21 = vrot.slane %v2535_v1, %v1164_v16  ;;  %v26_v29 = vld [vmem:[%s1195_s21] sm:$0xff]  ;;  %v1211_v30 = vld [vmem:[%s1195_s21 + $0x18] sm:$0xff]  ;;  %v1214_v31 = vld [vmem:[%s1195_s21 + $0x30] sm:$0xff] }
   0xc   : > { %v1184_v22 = vrot.slane %v2534_v2, %v52_v6  ;;  %v1187_v23 = vrot.slane %v2534_v2, %v72_v7  ;;  %v1190_v24 = vrot.slane %v2536_v0, %v108_v8  ;;  %v1198_v25 = vrot.slane %v2536_v0, %v144_v9  ;;  %2540 = vst [vmem:[#allocation8_spill] sm:$0xff] %v1214_v31  ;;  %v1230_v36 = vld [vmem:[%s1195_s21 + $0x48] sm:$0xff]  ;;  %v1233_v37 = vld [vmem:[%s1195_s21 + $0x60] sm:$0xff]  ;;  %v1252_v46 = vld [vmem:[%s1195_s21 + $0x31] sm:$0xff] }
   0xd   : > { %2537 = vst [vmem:[#allocation5_spill] sm:$0xff] %v1177_v20  ;;  %v1201_v26 = vrot.slane %v2535_v1, %v180_v10  ;;  %v1204_v27 = vrot.slane %v2534_v2, %v256_v11  ;;  %v1207_v28 = vrot.slane %v2534_v2, %v276_v12  ;;  %v1218_v32 = vrot.slane %v2536_v0, %v1164_v16  ;;  %v230_v41 = vld [vmem:[%s1195_s21 + $0x1] sm:$0xff]  ;;  %v1249_v45 = vld [vmem:[%s1195_s21 + $0x19] sm:$0xff]  ;;  %v1255_v47 = vld [vmem:[%s1195_s21 + $0x49] sm:$0xff] }
   0xe   : > { %2538 = vst [vmem:[#allocation6_spill] sm:$0xff] %v1198_v25  ;;  %v1221_v33 = vrot.slane %v2535_v1, %v52_v6  ;;  %v1224_v34 = vrot.slane %v2535_v1, %v72_v7  ;;  %v1227_v35 = vrot.slane %v2534_v2, %v108_v8  ;;  %2541 = vst [vmem:[#allocation9_spill] sm:$0xff] %v1230_v36  ;;  %v1262_v51 = vld [vmem:[%s1195_s21 + $0x61] sm:$0xff]  ;;  %v1280_v59 = vld [vmem:[%s1195_s21 + $0x32] sm:$0xff] }
   0xf   : > { %2539 = vst [vmem:[#allocation7_spill] sm:$0xff] %v1207_v28  ;;  %2542 = vst [vmem:[#allocation10_spill] sm:$0xff] %v1233_v37  ;;  %v54_v38 = vmul.f32 %v1156_v13, %v26_v29  ;;  %v74_v39 = vmul.f32 %v1159_v14, %v1211_v30  ;;  %v110_v40 = vmul.f32 %v1162_v15, %v1214_v31  ;;  %v434_v54 = vld [vmem:[%s1195_s21 + $0x2] sm:$0xff]  ;;  %v1270_v55 = vld [vmem:[%s1195_s21 + $0x1a] sm:$0xff] }
  0x10   : > { %v1242_v42 = vrot.slane %v2534_v2, %v144_v9  ;;  %v146_v43 = vmul.f32 %v1168_v17, %v1230_v36  ;;  %v182_v44 = vmul.f32 %v1171_v18, %v1233_v37  ;;  %2543 = vst [vmem:[#allocation11_spill] sm:$0xff] %v1255_v47  ;;  %v258_v48 = vmul.f32 %v1174_v19, %v230_v41  ;;  %v1286_v4 = vld [vmem:[%s1195_s21 + $0x4a] sm:$0xff]  ;;  %v1292_v7 = vld [vmem:[%s1195_s21 + $0x1b] sm:$0xff]  ;;  %v1303_v29 = vld [vmem:[%s1195_s21 + $0x33] sm:$0xff] }
  0x11   : > { %v1259_v49 = vrot.slane %v2536_v0, %v180_v10  ;;  %v90_v50 = vadd.f32 %v74_v39, %v54_v38  ;;  %2544 = vst [vmem:[#allocation12_spill] sm:$0xff] %v1262_v51  ;;  %v278_v52 = vmul.f32 %v1177_v20, %v1249_v45  ;;  %v314_v53 = vmul.f32 %v1181_v21, %v1252_v46  ;;  %v638_v6 = vld [vmem:[%s1195_s21 + $0x3] sm:$0xff] }
  0x12   : > { %v1273_v56 = vrot.slane %v2535_v1, %v256_v11  ;;  %v350_v57 = vmul.f32 %v1184_v22, %v1255_v47  ;;  %v386_v58 = vmul.f32 %v1187_v23, %v1262_v51  ;;  %2545 = vst [vmem:[#allocation13_spill] sm:$0xff] %v1280_v59  ;;  %v462_v60 = vmul.f32 %v1190_v24, %v434_v54  ;;  %v1298_v9 = vld [vmem:[%s1195_s21 + $0x62] sm:$0xff] }
  0x13   : > { %v482_v61 = vmul.f32 %v1198_v25, %v1270_v55  ;;  %v126_v62 = vadd.f32 %v110_v40, %v90_v50  ;;  %v294_v63 = vadd.f32 %v278_v52, %v258_v48  ;;  %2546 = vst [vmem:[#allocation14_spill] sm:$0xff] %v1286_v4  ;;  %v518_v5 = vmul.f32 %v1201_v26, %v1280_v59  ;;  %v842_v40 = vld [vmem:[%s1195_s21 + $0x4] sm:$0xff] }
  0x14   : > { %2547 = vst [vmem:[#allocation15_spill] sm:$0xff] %v1292_v7  ;;  %v1295_v8 = vrot.slane %v2535_v1, %v276_v12  ;;  %2548 = vst [vmem:[#allocation16_spill] sm:$0xff] %v1298_v9  ;;  %v554_v11 = vmul.f32 %v1204_v27, %v1286_v4  ;;  %v666_v38 = vmul.f32 %v1218_v32, %v638_v6  ;;  %v1312_v50 = vld [vmem:[%s1195_s21 + $0x4b] sm:$0xff]  ;;  %v1315_v52 = vld [vmem:[%s1195_s21 + $0x63] sm:$0xff] }
  0x15   : > { %v498_v10 = vadd.f32 %v482_v61, %v462_v60  ;;  %2549 = vst [vmem:[#allocation17_spill] sm:$0xff] %v1303_v29  ;;  %v686_v39 = vmul.f32 %v1221_v33, %v1292_v7  ;;  %v162_v41 = vadd.f32 %v146_v43, %v126_v62  ;;  %v330_v12 = vadd.f32 %v314_v53, %v294_v63  ;;  %v1320_v60 = vld [vmem:[%s1195_s21 + $0x1c] sm:$0xff]  ;;  %v1325_v43 = vld [vmem:[%s1195_s21 + $0x34] sm:$0xff]  ;;  %v27_v62 = vld [vmem:[%s1195_s21 + $0x8] sm:$0xff] }
  0x16   : > { %v590_v48 = vmul.f32 %v1207_v28, %v1298_v9  ;;  %2550 = vst [vmem:[#allocation18_spill] sm:$0xff] %v1312_v50  ;;  %2551 = vst [vmem:[#allocation19_spill] sm:$0xff] %v1315_v52  ;;  %v722_v54 = vmul.f32 %v1224_v34, %v1303_v29  ;;  %v758_v0 = vmul.f32 %v1227_v35, %v1312_v50  ;;  %v1330_v63 = vld [vmem:[%s1195_s21 + $0x20] sm:$0xff]  ;;  %v1339_v50 = vld [vmem:[%s1195_s21 + $0x4c] sm:$0xff] }
  0x17   : > { %2552 = vst [vmem:[#allocation20_spill] sm:$0xff] %v1320_v60  ;;  %v534_v61 = vadd.f32 %v518_v5, %v498_v10  ;;  %v702_v6 = vadd.f32 %v686_v39, %v666_v38  ;;  %2553 = vst [vmem:[#allocation21_spill] sm:$0xff] %v1325_v43  ;;  %v870_v53 = vmul.f32 %v1259_v49, %v842_v40 }
  0x18   : > { %2554 = vst [vmem:[#allocation22_spill] sm:$0xff] %v1330_v63  ;;  %v366_v1 = vadd.f32 %v350_v57, %v330_v12  ;;  %v794_v29 = vmul.f32 %v1242_v42, %v1315_v52  ;;  %v890_v5 = vmul.f32 %v1273_v56, %v1320_v60  ;;  %v926_v10 = vmul.f32 %v1295_v8, %v1325_v43  ;;  %v1346_v52 = vld [vmem:[%s1195_s21 + $0x38] sm:$0xff] }
  0x19   : > { %v198_v38 = vadd.f32 %v182_v44, %v162_v41  ;;  %v570_v39 = vadd.f32 %v554_v11, %v534_v61  ;;  %v738_v40 = vadd.f32 %v722_v54, %v702_v6  ;;  %2555 = vst [vmem:[#allocation23_spill] sm:$0xff] %v1339_v50  ;;  %v1343_v7 = vrot.slane %v2534_v2, %v1164_v16  ;;  %v231_v41 = vld [vmem:[%s1195_s21 + $0x9] sm:$0xff]  ;;  %v1353_v11 = vld [vmem:[%s1195_s21 + $0x21] sm:$0xff] }
  0x1a   : > { %v402_v57 = vadd.f32 %v386_v58, %v366_v1  ;;  %v906_v12 = vadd.f32 %v890_v5, %v870_v53  ;;  %2556 = vst [vmem:[#allocation24_spill] sm:$0xff] %v1346_v52  ;;  %v55_v60 = vmul.f32 %v1156_v13, %v27_v62  ;;  %v75_v44 = vmul.f32 %v1159_v14, %v1330_v63  ;;  %v1356_v16 = vld [vmem:[%s1195_s21 + $0x64] sm:$0xff]  ;;  %v1361_v58 = vld [vmem:[%s1195_s21 + $0x50] sm:$0xff] }
  0x1b   : > { %2557 = vst [vmem:[#allocation25_spill] sm:$0xff] %v1353_v11  ;;  %v606_v54 = vadd.f32 %v590_v48, %v570_v39  ;;  %v774_v61 = vadd.f32 %v758_v0, %v738_v40  ;;  %2558 = vst [vmem:[#allocation26_spill] sm:$0xff] %v1356_v16  ;;  %v962_v1 = vmul.f32 %v1343_v7, %v1339_v50  ;;  %v1368_v5 = vld [vmem:[%s1195_s21 + $0x68] sm:$0xff] }
  0x1c   : > { %2559 = vst [vmem:[#allocation27_spill] sm:$0xff] %v1361_v58  ;;  %v111_v6 = vmul.f32 %v1162_v15, %v1346_v52  ;;  %v942_v53 = vadd.f32 %v926_v10, %v906_v12  ;;  %v998_v62 = vmul.f32 %v1145_v3, %v1356_v16  ;;  %2560 = vst [vmem:[#allocation28_spill] sm:$0xff] %v1368_v5  ;;  %v435_v39 = vld [vmem:[%s1195_s21 + $0xa] sm:$0xff]  ;;  %v1376_v52 = vld [vmem:[%s1195_s21 + $0x39] sm:$0xff] }
  0x1d   : > { %v91_v0 = vadd.f32 %v75_v44, %v55_v60  ;;  %v147_v48 = vmul.f32 %v1168_v17, %v1361_v58  ;;  %v810_v40 = vadd.f32 %v794_v29, %v774_v61  ;;  %v183_v2 = vmul.f32 %v1171_v18, %v1368_v5  ;;  %2561 = vst [vmem:[#allocation29_spill] sm:$0xff] %v1376_v52  ;;  %v1382_v63 = vld [vmem:[%s1195_s21 + $0x22] sm:$0xff]  ;;  %v1385_v29 = vld [vmem:[%s1195_s21 + $0x51] sm:$0xff] }
  0x1e   : > { %v259_v10 = vmul.f32 %v1174_v19, %v231_v41  ;;  %v279_v12 = vmul.f32 %v1177_v20, %v1353_v11  ;;  %2562 = vst [vmem:[#allocation30_spill] sm:$0xff] %v1382_v63  ;;  %v622_v60 = vadd.f32 %v606_v54, %v198_v38  ;;  %v978_v44 = vadd.f32 %v962_v1, %v942_v53  ;;  %v639_v5 = vld [vmem:[%s1195_s21 + $0xb] sm:$0xff]  ;;  %v1393_v11 = vld [vmem:[%s1195_s21 + $0x3a] sm:$0xff]  ;;  %v1397_v54 = vld [vmem:[%s1195_s21 + $0x23] sm:$0xff] }
  0x1f   : > { %v127_v58 = vadd.f32 %v111_v6, %v91_v0  ;;  %2563 = vst [vmem:[#allocation31_spill] sm:$0xff] %v1385_v29  ;;  %v315_v61 = vmul.f32 %v1181_v21, %v1376_v52  ;;  %v826_v16 = vadd.f32 %v810_v40, %v402_v57  ;;  %v351_v50 = vmul.f32 %v1184_v22, %v1385_v29  ;;  %v1401_v53 = vld [vmem:[%s1195_s21 + $0x69] sm:$0xff]  ;;  %v1404_v57 = vld [vmem:[%s1195_s21 + $0x52] sm:$0xff]  ;;  %v1445_v52 = vld [vmem:[%s1195_s21 + $0x3c] sm:$0xff] }
  0x20   : > { %v295_v41 = vadd.f32 %v279_v12, %v259_v10  ;;  %2564 = vst [vmem:[#allocation32_spill] sm:$0xff] %v1393_v11  ;;  %v463_v38 = vmul.f32 %v1190_v24, %v435_v39  ;;  %2565 = vst [vmem:[#allocation33_spill] sm:$0xff] %v1397_v54  ;;  %v1014_v1 = vadd.f32 %v998_v62, %v978_v44  ;;  %v1413_v62 = vld [vmem:[%s1195_s21 + $0x6a] sm:$0xff] }
  0x21   : > { %v163_v6 = vadd.f32 %v147_v48, %v127_v58  ;;  %2566 = vst [vmem:[#allocation34_spill] sm:$0xff] %v1401_v53  ;;  %2567 = vst [vmem:[#allocation35_spill] sm:$0xff] %v1404_v57  ;;  %v483_v0 = vmul.f32 %v1198_v25, %v1382_v63  ;;  %v519_v40 = vmul.f32 %v1201_v26, %v1393_v11  ;;  %v843_v12 = vld [vmem:[%s1195_s21 + $0xc] sm:$0xff]  ;;  %v1422_v11 = vld [vmem:[%s1195_s21 + $0x3b] sm:$0xff] }
  0x22   : > { %v331_v10 = vadd.f32 %v315_v61, %v295_v41  ;;  %v387_v39 = vmul.f32 %v1187_v23, %v1401_v53  ;;  %2568 = vst [vmem:[#allocation36_spill] sm:$0xff] %v1413_v62  ;;  %v555_v58 = vmul.f32 %v1204_v27, %v1404_v57  ;;  %v667_v48 = vmul.f32 %v1218_v32, %v639_v5  ;;  %v1425_v61 = vld [vmem:[%s1195_s21 + $0x53] sm:$0xff]  ;;  %v1430_v53 = vld [vmem:[%s1195_s21 + $0x24] sm:$0xff] }
  0x23   : > { %v1030_v44 = vadd.f32 %v1014_v1, %v622_v60  ;;  %v499_v29 = vadd.f32 %v483_v0, %v463_v38  ;;  %v591_v63 = vmul.f32 %v1207_v28, %v1413_v62  ;;  %v687_v41 = vmul.f32 %v1221_v33, %v1397_v54  ;;  %v1442_v54 = vld [vmem:[%s1195_s21 + $0x6b] sm:$0xff] }
  0x24   : > { %v199_v5 = vadd.f32 %v183_v2, %v163_v6  ;;  %v367_v60 = vadd.f32 %v351_v50, %v331_v10  ;;  %v723_v38 = vmul.f32 %v1224_v34, %v1422_v11  ;;  %v759_v1 = vmul.f32 %v1227_v35, %v1425_v61  ;;  %2569 = vst [vmem:[#allocation37_spill] sm:$0xff] %v1442_v54  ;;  %v1451_v50 = vld [vmem:[%s1195_s21 + $0x54] sm:$0xff]  ;;  %v1459_v10 = vld [vmem:[%s1195_s21 + $0x6c] sm:$0xff] }
  0x25   : > { %v1046_v0 = vadd.f32 %v1030_v44, %v826_v16  ;;  %v535_v62 = vadd.f32 %v519_v40, %v499_v29  ;;  %v703_v57 = vadd.f32 %v687_v41, %v667_v48  ;;  %v871_v43 = vmul.f32 %v1259_v49, %v843_v12  ;;  %2570 = vst [vmem:[#allocation38_spill] sm:$0xff] %v1451_v50 }
  0x26   : > { %v403_v28 = vadd.f32 %v387_v39, %v367_v60  ;;  %v795_v2 = vmul.f32 %v1242_v42, %v1442_v54  ;;  %v891_v6 = vmul.f32 %v1273_v56, %v1430_v53  ;;  %v927_v16 = vmul.f32 %v1295_v8, %v1445_v52  ;;  %2571 = vst [vmem:[#allocation39_spill] sm:$0xff] %v1459_v10 }
  0x27   : > { %1064 = vst [vmem:[%s1435_s25] sm:$0xff] %v1046_v0  ;;  %v571_v29 = vadd.f32 %v555_v58, %v535_v62  ;;  %v739_v40 = vadd.f32 %v723_v38, %v703_v57  ;;  %v963_v39 = vmul.f32 %v1343_v7, %v1451_v50  ;;  %v56_v48 = vmul.f32 %v1156_v13, %v1211_v30 }
  0x28   : > { %v907_v12 = vadd.f32 %v891_v6, %v871_v43  ;;  %v999_v44 = vmul.f32 %v1145_v3, %v1459_v10  ;;  %v76_v41 = vmul.f32 %v1159_v14, %v1214_v31  ;;  %v112_v60 = vmul.f32 %v1162_v15, %v1230_v36  ;;  %v1476_v43 = vld [vmem:[%s1195_s21 + $0x78] sm:$0xff] }
  0x29   : > { %v607_v57 = vadd.f32 %v591_v63, %v571_v29  ;;  %v775_v62 = vadd.f32 %v759_v1, %v739_v40  ;;  %v148_v58 = vmul.f32 %v1168_v17, %v1233_v37  ;;  %v260_v38 = vmul.f32 %v1174_v19, %v1249_v45  ;;  %2572 = vst [vmem:[#allocation40_spill] sm:$0xff] %v1476_v43  ;;  %v1487_v29 = vld [vmem:[%s1195_s21 + $0x79] sm:$0xff] }
  0x2a   : > { %v943_v30 = vadd.f32 %v927_v16, %v907_v12  ;;  %v92_v0 = vadd.f32 %v76_v41, %v56_v48  ;;  %v280_v6 = vmul.f32 %v1177_v20, %v1252_v46  ;;  %v316_v31 = vmul.f32 %v1181_v21, %v1255_v47  ;;  %2573 = vst [vmem:[#allocation41_spill] sm:$0xff] %v1487_v29 }
  0x2b   : > { %v623_v36 = vadd.f32 %v607_v57, %v199_v5  ;;  %v811_v10 = vadd.f32 %v795_v2, %v775_v62  ;;  %v184_v63 = vmul.f32 %v1171_v18, %v1476_v43  ;;  %v352_v1 = vmul.f32 %v1184_v22, %v1262_v51 }
  0x2c   : > { %v979_v45 = vadd.f32 %v963_v39, %v943_v30  ;;  %v128_v16 = vadd.f32 %v112_v60, %v92_v0  ;;  %v296_v40 = vadd.f32 %v280_v6, %v260_v38  ;;  %v464_v48 = vmul.f32 %v1190_v24, %v1270_v55  ;;  %v1500_v38 = vld [vmem:[%s1195_s21 + $0x7a] sm:$0xff] }
  0x2d   : > { %v827_v12 = vadd.f32 %v811_v10, %v403_v28  ;;  %v388_v5 = vmul.f32 %v1187_v23, %v1487_v29  ;;  %v484_v2 = vmul.f32 %v1198_v25, %v1280_v59  ;;  %v520_v41 = vmul.f32 %v1201_v26, %v1286_v4  ;;  %2574 = vst [vmem:[#allocation42_spill] sm:$0xff] %v1500_v38  ;;  %v2575_v28 = vld [vmem:[#allocation15_spill] sm:$0xff]  ;;  %v2576_v30 = vld [vmem:[#allocation17_spill] sm:$0xff]  ;;  %v2577_v6 = vld [vmem:[#allocation18_spill] sm:$0xff] }
  0x2e   : > { %v1015_v57 = vadd.f32 %v999_v44, %v979_v45  ;;  %v164_v39 = vadd.f32 %v148_v58, %v128_v16  ;;  %v332_v60 = vadd.f32 %v316_v31, %v296_v40  ;;  %v556_v62 = vmul.f32 %v1204_v27, %v1298_v9  ;;  %v2578_v31 = vld [vmem:[#allocation7_spill] sm:$0xff]  ;;  %v1511_v16 = vld [vmem:[%s1195_s21 + $0x7b] sm:$0xff] }
  0x2f   : > { %v500_v55 = vadd.f32 %v484_v2, %v464_v48  ;;  %v668_v10 = vmul.f32 %v1218_v32, %v2575_v28  ;;  %v688_v0 = vmul.f32 %v1221_v33, %v2576_v30  ;;  %v724_v59 = vmul.f32 %v1224_v34, %v2577_v6  ;;  %2579 = vst [vmem:[#allocation15_spill] sm:$0xff] %v1511_v16  ;;  %v2580_v48 = vld [vmem:[#allocation19_spill] sm:$0xff]  ;;  %v2581_v28 = vld [vmem:[#allocation20_spill] sm:$0xff] }
  0x30   : > { %v1031_v29 = vadd.f32 %v1015_v57, %v623_v36  ;;  %v200_v4 = vadd.f32 %v184_v63, %v164_v39  ;;  %v368_v44 = vadd.f32 %v352_v1, %v332_v60  ;;  %v592_v58 = vmul.f32 %v2578_v31, %v1500_v38  ;;  %v2582_v63 = vld [vmem:[#allocation21_spill] sm:$0xff]  ;;  %v2583_v57 = vld [vmem:[#allocation23_spill] sm:$0xff] }
  0x31   : > { %v536_v45 = vadd.f32 %v520_v41, %v500_v55  ;;  %v704_v40 = vadd.f32 %v688_v0, %v668_v10  ;;  %v760_v2 = vmul.f32 %v1227_v35, %v2580_v48  ;;  %v872_v30 = vmul.f32 %v1259_v49, %v2581_v28  ;;  %v2584_v10 = vld [vmem:[#allocation26_spill] sm:$0xff]  ;;  %v2588_v6 = vld [vmem:[#allocation27_spill] sm:$0xff] }
  0x32   : > { %v1047_v9 = vadd.f32 %v1031_v29, %v827_v12  ;;  %v796_v36 = vmul.f32 %v1242_v42, %v1511_v16  ;;  %v892_v1 = vmul.f32 %v1273_v56, %v2582_v63  ;;  %v928_v39 = vmul.f32 %v1295_v8, %v2583_v57  ;;  %v1527_v48 = vld [vmem:[%s1195_s21 + $0x7c] sm:$0xff]  ;;  %v2587_v16 = vld [vmem:[#allocation24_spill] sm:$0xff] }
  0x33   : > { %v404_v41 = vadd.f32 %v388_v5, %v368_v44  ;;  %v572_v60 = vadd.f32 %v556_v62, %v536_v45  ;;  %v740_v55 = vadd.f32 %v724_v59, %v704_v40  ;;  %v964_v0 = vmul.f32 %v1343_v7, %v2584_v10  ;;  %2585 = vst [vmem:[#allocation7_spill] sm:$0xff] %v1527_v48  ;;  %v2586_v12 = vld [vmem:[#allocation22_spill] sm:$0xff]  ;;  %v2589_v44 = vld [vmem:[#allocation28_spill] sm:$0xff] }
  0x34   : > { %1065 = vst [vmem:[%s1435_s25 + $0x8] sm:$0xff] %v1047_v9  ;;  %v908_v29 = vadd.f32 %v892_v1, %v872_v30  ;;  %v57_v28 = vmul.f32 %v1156_v13, %v2586_v12  ;;  %v77_v63 = vmul.f32 %v1159_v14, %v2587_v16  ;;  %v113_v57 = vmul.f32 %v1162_v15, %v2588_v6  ;;  %v1540_v30 = vld [vmem:[%s1195_s21 + $0x80] sm:$0xff]  ;;  %v2591_v1 = vld [vmem:[#allocation25_spill] sm:$0xff] }
  0x35   : > { %v608_v5 = vadd.f32 %v592_v58, %v572_v60  ;;  %v776_v62 = vadd.f32 %v760_v2, %v740_v55  ;;  %v1000_v59 = vmul.f32 %v1145_v3, %v1527_v48  ;;  %v149_v9 = vmul.f32 %v1168_v17, %v2589_v44  ;;  %2590 = vst [vmem:[#allocation20_spill] sm:$0xff] %v1540_v30  ;;  %v2592_v16 = vld [vmem:[#allocation29_spill] sm:$0xff]  ;;  %v2593_v2 = vld [vmem:[#allocation31_spill] sm:$0xff] }
  0x36   : > { %v944_v45 = vadd.f32 %v928_v39, %v908_v29  ;;  %v93_v40 = vadd.f32 %v77_v63, %v57_v28  ;;  %v261_v12 = vmul.f32 %v1174_v19, %v2591_v1  ;;  %v281_v10 = vmul.f32 %v1177_v20, %v2592_v16  ;;  %v1551_v29 = vld [vmem:[%s1195_s21 + $0x81] sm:$0xff]  ;;  %v2600_v44 = vld [vmem:[#allocation33_spill] sm:$0xff] }
  0x37   : > { %v624_v6 = vadd.f32 %v608_v5, %v200_v4  ;;  %v812_v38 = vadd.f32 %v796_v36, %v776_v62  ;;  %v185_v58 = vmul.f32 %v1171_v18, %v1540_v30  ;;  %v317_v60 = vmul.f32 %v1181_v21, %v2593_v2  ;;  %2594 = vst [vmem:[#allocation22_spill] sm:$0xff] %v1551_v29  ;;  %v2595_v28 = vld [vmem:[#allocation34_spill] sm:$0xff]  ;;  %v2597_v5 = vld [vmem:[#allocation32_spill] sm:$0xff]  ;;  %v2598_v30 = vld [vmem:[#allocation35_spill] sm:$0xff] }
  0x38   : > { %v980_v55 = vadd.f32 %v964_v0, %v944_v45  ;;  %v129_v39 = vadd.f32 %v113_v57, %v93_v40  ;;  %v297_v63 = vadd.f32 %v281_v10, %v261_v12  ;;  %v353_v1 = vmul.f32 %v1184_v22, %v2595_v28  ;;  %v2596_v4 = vld [vmem:[#allocation30_spill] sm:$0xff]  ;;  %v2599_v28 = vld [vmem:[#allocation36_spill] sm:$0xff] }
  0x39   : > { %v389_v16 = vmul.f32 %v1187_v23, %v1551_v29  ;;  %v465_v36 = vmul.f32 %v1190_v24, %v2596_v4  ;;  %v485_v62 = vmul.f32 %v1198_v25, %v2597_v5  ;;  %v521_v2 = vmul.f32 %v1201_v26, %v2598_v30  ;;  %v1564_v40 = vld [vmem:[%s1195_s21 + $0x82] sm:$0xff] }
  0x3a   : > { %v828_v57 = vadd.f32 %v812_v38, %v404_v41  ;;  %v1016_v0 = vadd.f32 %v1000_v59, %v980_v55  ;;  %v165_v45 = vadd.f32 %v149_v9, %v129_v39  ;;  %v333_v10 = vadd.f32 %v317_v60, %v297_v63  ;;  %v1577_v60 = vld [vmem:[%s1195_s21 + $0x83] sm:$0xff] }
  0x3b   : > { %v501_v12 = vadd.f32 %v485_v62, %v465_v36  ;;  %v557_v29 = vmul.f32 %v1204_v27, %v2599_v28  ;;  %v669_v4 = vmul.f32 %v1218_v32, %v2600_v44  ;;  %v689_v5 = vmul.f32 %v1221_v33, %v1422_v11  ;;  %2601 = vst [vmem:[#allocation25_spill] sm:$0xff] %v1577_v60  ;;  %v1591_v62 = vld [vmem:[%s1195_s21 + $0x84] sm:$0xff] }
  0x3c   : > { %v1032_v48 = vadd.f32 %v1016_v0, %v624_v6  ;;  %v369_v25 = vadd.f32 %v353_v1, %v333_v10  ;;  %v593_v38 = vmul.f32 %v2578_v31, %v1564_v40  ;;  %v725_v41 = vmul.f32 %v1224_v34, %v1425_v61  ;;  %2602 = vst [vmem:[#allocation30_spill] sm:$0xff] %v1591_v62  ;;  %v2605_v10 = vld [vmem:[#allocation9_spill] sm:$0xff] }
  0x3d   : > { %v201_v59 = vadd.f32 %v185_v58, %v165_v45  ;;  %v537_v9 = vadd.f32 %v521_v2, %v501_v12  ;;  %v705_v55 = vadd.f32 %v689_v5, %v669_v4  ;;  %v761_v44 = vmul.f32 %v1227_v35, %v1442_v54  ;;  %v2604_v45 = vld [vmem:[#allocation8_spill] sm:$0xff] }
  0x3e   : > { %v1048_v39 = vadd.f32 %v1032_v48, %v828_v57  ;;  %v797_v6 = vmul.f32 %v1242_v42, %v1577_v60  ;;  %v873_v63 = vmul.f32 %v1259_v49, %v1430_v53  ;;  %v893_v1 = vmul.f32 %v1273_v56, %v1445_v52  ;;  %v2603_v57 = vld [vmem:[#allocation39_spill] sm:$0xff] }
  0x3f   : > { %v405_v36 = vadd.f32 %v389_v16, %v369_v25  ;;  %v573_v58 = vadd.f32 %v557_v29, %v537_v9  ;;  %v741_v2 = vadd.f32 %v725_v41, %v705_v55  ;;  %v929_v5 = vmul.f32 %v1295_v8, %v1451_v50  ;;  %v1604_v9 = vld [vmem:[%s1195_s21 + $0x90] sm:$0xff] }
  0x40   : > { %1066 = vst [vmem:[%s1435_s25 + $0x10] sm:$0xff] %v1048_v39  ;;  %v909_v48 = vadd.f32 %v893_v1, %v873_v63  ;;  %v965_v0 = vmul.f32 %v1343_v7, %v2603_v57  ;;  %v58_v53 = vmul.f32 %v1156_v13, %v2604_v45  ;;  %v78_v12 = vmul.f32 %v1159_v14, %v2605_v10  ;;  %v1617_v45 = vld [vmem:[%s1195_s21 + $0x91] sm:$0xff] }
  0x41   : > { %v609_v4 = vadd.f32 %v593_v38, %v573_v58  ;;  %v777_v25 = vadd.f32 %v761_v44, %v741_v2  ;;  %v1001_v16 = vmul.f32 %v1145_v3, %v1591_v62  ;;  %v114_v29 = vmul.f32 %v1162_v15, %v1233_v37  ;;  %2606 = vst [vmem:[#allocation35_spill] sm:$0xff] %v1604_v9 }
  0x42   : > { %v945_v41 = vadd.f32 %v929_v5, %v909_v48  ;;  %v94_v55 = vadd.f32 %v78_v12, %v58_v53  ;;  %v150_v39 = vmul.f32 %v1168_v17, %v1476_v43  ;;  %v262_v63 = vmul.f32 %v1174_v19, %v1252_v46  ;;  %2607 = vst [vmem:[#allocation33_spill] sm:$0xff] %v1617_v45  ;;  %v2608_v53 = vld [vmem:[#allocation41_spill] sm:$0xff]  ;;  %v2611_v43 = vld [vmem:[#allocation6_spill] sm:$0xff] }
  0x43   : > { %v813_v1 = vadd.f32 %v797_v6, %v777_v25  ;;  %v186_v38 = vmul.f32 %v1171_v18, %v1604_v9  ;;  %v282_v44 = vmul.f32 %v1177_v20, %v1255_v47  ;;  %v318_v58 = vmul.f32 %v1181_v21, %v1262_v51  ;;  %v2609_v25 = vld [vmem:[#allocation13_spill] sm:$0xff]  ;;  %v2610_v47 = vld [vmem:[#allocation14_spill] sm:$0xff] }
  0x44   : > { %v625_v2 = vadd.f32 %v609_v4, %v201_v59  ;;  %v981_v5 = vadd.f32 %v965_v0, %v945_v41  ;;  %v130_v48 = vadd.f32 %v114_v29, %v94_v55  ;;  %v354_v12 = vmul.f32 %v1184_v22, %v2608_v53  ;;  %v2612_v0 = vld [vmem:[#allocation16_spill] sm:$0xff] }
  0x45   : > { %v298_v46 = vadd.f32 %v282_v44, %v262_v63  ;;  %v390_v6 = vmul.f32 %v1187_v23, %v1617_v45  ;;  %v466_v9 = vmul.f32 %v1190_v24, %v2609_v25  ;;  %v486_v37 = vmul.f32 %v2611_v43, %v2610_v47  ;;  %v1630_v41 = vld [vmem:[%s1195_s21 + $0x92] sm:$0xff]  ;;  %v2614_v63 = vld [vmem:[#allocation42_spill] sm:$0xff] }
  0x46   : > { %v829_v10 = vadd.f32 %v813_v1, %v405_v36  ;;  %v1017_v51 = vadd.f32 %v1001_v16, %v981_v5  ;;  %v166_v59 = vadd.f32 %v150_v39, %v130_v48  ;;  %v522_v4 = vmul.f32 %v1201_v26, %v2612_v0  ;;  %2613 = vst [vmem:[#allocation8_spill] sm:$0xff] %v1630_v41  ;;  %v2615_v45 = vld [vmem:[#allocation17_spill] sm:$0xff]  ;;  %v2616_v16 = vld [vmem:[#allocation18_spill] sm:$0xff]  ;;  %v2617_v1 = vld [vmem:[#allocation19_spill] sm:$0xff] }
  0x47   : > { %v334_v29 = vadd.f32 %v318_v58, %v298_v46  ;;  %v502_v55 = vadd.f32 %v486_v37, %v466_v9  ;;  %v558_v44 = vmul.f32 %v1204_v27, %v2614_v63  ;;  %v670_v25 = vmul.f32 %v1218_v32, %v2615_v45  ;;  %v2618_v48 = vld [vmem:[#allocation15_spill] sm:$0xff]  ;;  %v1645_v45 = vld [vmem:[%s1195_s21 + $0x93] sm:$0xff] }
  0x48   : > { %v1033_v53 = vadd.f32 %v1017_v51, %v625_v2  ;;  %v594_v36 = vmul.f32 %v2578_v31, %v1630_v41  ;;  %v690_v39 = vmul.f32 %v1221_v33, %v2616_v16  ;;  %v726_v58 = vmul.f32 %v1224_v34, %v2617_v1  ;;  %2619 = vst [vmem:[#allocation13_spill] sm:$0xff] %v1645_v45  ;;  %v2620_v2 = vld [vmem:[#allocation21_spill] sm:$0xff]  ;;  %v2621_v0 = vld [vmem:[#allocation23_spill] sm:$0xff] }
  0x49   : > { %v202_v5 = vadd.f32 %v186_v38, %v166_v59  ;;  %v370_v37 = vadd.f32 %v354_v12, %v334_v29  ;;  %v538_v9 = vadd.f32 %v522_v4, %v502_v55  ;;  %v762_v46 = vmul.f32 %v1227_v35, %v2618_v48  ;;  %v2622_v12 = vld [vmem:[#allocation26_spill] sm:$0xff]  ;;  %v2624_v29 = vld [vmem:[#allocation7_spill] sm:$0xff] }
  0x4a   : > { %v1049_v63 = vadd.f32 %v1033_v53, %v829_v10  ;;  %v706_v51 = vadd.f32 %v690_v39, %v670_v25  ;;  %v874_v41 = vmul.f32 %v1259_v49, %v2620_v2  ;;  %v894_v16 = vmul.f32 %v1273_v56, %v2621_v0  ;;  %v1657_v53 = vld [vmem:[%s1195_s21 + $0x94] sm:$0xff]  ;;  %v2632_v0 = vld [vmem:[#allocation34_spill] sm:$0xff] }
  0x4b   : > { %v406_v47 = vadd.f32 %v390_v6, %v370_v37  ;;  %v574_v1 = vadd.f32 %v558_v44, %v538_v9  ;;  %v798_v38 = vmul.f32 %v1242_v42, %v1645_v45  ;;  %v930_v59 = vmul.f32 %v1295_v8, %v2622_v12  ;;  %2623 = vst [vmem:[#allocation6_spill] sm:$0xff] %v1657_v53  ;;  %v2625_v25 = vld [vmem:[#allocation24_spill] sm:$0xff]  ;;  %v2626_v37 = vld [vmem:[#allocation27_spill] sm:$0xff]  ;;  %v2630_v12 = vld [vmem:[#allocation29_spill] sm:$0xff] }
  0x4c   : > { %1067 = vst [vmem:[%s1435_s25 + $0x18] sm:$0xff] %v1049_v63  ;;  %v742_v10 = vadd.f32 %v726_v58, %v706_v51  ;;  %v910_v4 = vadd.f32 %v894_v16, %v874_v41  ;;  %v966_v55 = vmul.f32 %v1343_v7, %v2624_v29  ;;  %v59_v39 = vmul.f32 %v1156_v13, %v2625_v25  ;;  %v2627_v2 = vld [vmem:[#allocation28_spill] sm:$0xff]  ;;  %v1670_v41 = vld [vmem:[%s1195_s21 + $0x98] sm:$0xff] }
  0x4d   : > { %v610_v6 = vadd.f32 %v594_v36, %v574_v1  ;;  %v1002_v44 = vmul.f32 %v1145_v3, %v1657_v53  ;;  %v79_v9 = vmul.f32 %v1159_v14, %v2626_v37  ;;  %v115_v63 = vmul.f32 %v1162_v15, %v2627_v2  ;;  %2628 = vst [vmem:[#allocation17_spill] sm:$0xff] %v1670_v41  ;;  %v2629_v16 = vld [vmem:[#allocation20_spill] sm:$0xff]  ;;  %v2631_v53 = vld [vmem:[#allocation31_spill] sm:$0xff]  ;;  %v1685_v48 = vld [vmem:[%s1195_s21 + $0x99] sm:$0xff] }
  0x4e   : > { %v778_v58 = vadd.f32 %v762_v46, %v742_v10  ;;  %v946_v51 = vadd.f32 %v930_v59, %v910_v4  ;;  %v151_v29 = vmul.f32 %v1168_v17, %v2629_v16  ;;  %v263_v36 = vmul.f32 %v1174_v19, %v2630_v12  ;;  %v2633_v4 = vld [vmem:[#allocation22_spill] sm:$0xff]  ;;  %2634 = vst [vmem:[#allocation21_spill] sm:$0xff] %v1685_v48 }
  0x4f   : > { %v95_v1 = vadd.f32 %v79_v9, %v59_v39  ;;  %v187_v25 = vmul.f32 %v1171_v18, %v1670_v41  ;;  %v283_v37 = vmul.f32 %v1177_v20, %v2631_v53  ;;  %v319_v2 = vmul.f32 %v1181_v21, %v2632_v0  ;;  %v2635_v39 = vld [vmem:[#allocation32_spill] sm:$0xff] }
  0x50   : > { %v626_v46 = vadd.f32 %v610_v6, %v202_v5  ;;  %v814_v59 = vadd.f32 %v798_v38, %v778_v58  ;;  %v982_v10 = vadd.f32 %v966_v55, %v946_v51  ;;  %v355_v16 = vmul.f32 %v1184_v22, %v2633_v4  ;;  %v1698_v51 = vld [vmem:[%s1195_s21 + $0x9a] sm:$0xff] }
  0x51   : > { %v131_v45 = vadd.f32 %v115_v63, %v95_v1  ;;  %v299_v12 = vadd.f32 %v283_v37, %v263_v36  ;;  %v467_v9 = vmul.f32 %v1190_v24, %v2635_v39  ;;  %v487_v53 = vmul.f32 %v2611_v43, %v2598_v30  ;;  %2636 = vst [vmem:[#allocation24_spill] sm:$0xff] %v1698_v51 }
  0x52   : > { %v830_v41 = vadd.f32 %v814_v59, %v406_v47  ;;  %v1018_v20 = vadd.f32 %v1002_v44, %v982_v10  ;;  %v391_v5 = vmul.f32 %v1187_v23, %v1685_v48  ;;  %v523_v38 = vmul.f32 %v1201_v26, %v2599_v28 }
  0x53   : > { %v167_v55 = vadd.f32 %v151_v29, %v131_v45  ;;  %v335_v6 = vadd.f32 %v319_v2, %v299_v12  ;;  %v503_v63 = vadd.f32 %v487_v53, %v467_v9  ;;  %v559_v37 = vmul.f32 %v1204_v27, %v1564_v40  ;;  %v1709_v2 = vld [vmem:[%s1195_s21 + $0x9b] sm:$0xff] }
  0x54   : > { %v1034_v58 = vadd.f32 %v1018_v20, %v626_v46  ;;  %v671_v47 = vmul.f32 %v1218_v32, %v1422_v11  ;;  %v691_v44 = vmul.f32 %v1221_v33, %v1425_v61  ;;  %v727_v36 = vmul.f32 %v1224_v34, %v1442_v54  ;;  %2637 = vst [vmem:[#allocation29_spill] sm:$0xff] %v1709_v2 }
  0x55   : > { %v203_v1 = vadd.f32 %v187_v25, %v167_v55  ;;  %v371_v45 = vadd.f32 %v355_v16, %v335_v6  ;;  %v539_v29 = vadd.f32 %v523_v38, %v503_v63  ;;  %v595_v53 = vmul.f32 %v2578_v31, %v1698_v51  ;;  %v2638_v38 = vld [vmem:[#allocation9_spill] sm:$0xff] }
  0x56   : > { %v1050_v20 = vadd.f32 %v1034_v58, %v830_v41  ;;  %v707_v46 = vadd.f32 %v691_v44, %v671_v47  ;;  %v763_v11 = vmul.f32 %v1227_v35, %v1577_v60  ;;  %v875_v59 = vmul.f32 %v1259_v49, %v1445_v52  ;;  %v1727_v6 = vld [vmem:[%s1195_s21 + $0x9c] sm:$0xff]  ;;  %v2641_v47 = vld [vmem:[#allocation40_spill] sm:$0xff] }
  0x57   : > { %v575_v10 = vadd.f32 %v559_v37, %v539_v29  ;;  %v799_v16 = vmul.f32 %v1242_v42, %v1709_v2  ;;  %v895_v25 = vmul.f32 %v1273_v56, %v1451_v50  ;;  %v931_v41 = vmul.f32 %v1295_v8, %v2603_v57  ;;  %2639 = vst [vmem:[#allocation34_spill] sm:$0xff] %v1727_v6  ;;  %v2640_v37 = vld [vmem:[#allocation10_spill] sm:$0xff]  ;;  %v2648_v57 = vld [vmem:[#allocation33_spill] sm:$0xff] }
  0x58   : > { %1068 = vst [vmem:[%s1435_s25 + $0x20] sm:$0xff] %v1050_v20  ;;  %v407_v12 = vadd.f32 %v391_v5, %v371_v45  ;;  %v743_v39 = vadd.f32 %v727_v36, %v707_v46  ;;  %v967_v9 = vmul.f32 %v1343_v7, %v1591_v62  ;;  %v60_v52 = vmul.f32 %v1156_v13, %v2638_v38  ;;  %v1736_v36 = vld [vmem:[%s1195_s21 + $0xa8] sm:$0xff]  ;;  %v2645_v38 = vld [vmem:[#allocation12_spill] sm:$0xff]  ;;  %v2647_v62 = vld [vmem:[#allocation41_spill] sm:$0xff] }
  0x59   : > { %v611_v55 = vadd.f32 %v595_v53, %v575_v10  ;;  %v911_v63 = vadd.f32 %v895_v25, %v875_v59  ;;  %v80_v58 = vmul.f32 %v1159_v14, %v2640_v37  ;;  %v116_v44 = vmul.f32 %v1162_v15, %v2641_v47  ;;  %2642 = vst [vmem:[#allocation32_spill] sm:$0xff] %v1736_v36  ;;  %v2643_v45 = vld [vmem:[#allocation35_spill] sm:$0xff]  ;;  %v2646_v47 = vld [vmem:[#allocation5_spill] sm:$0xff] }
  0x5a   : > { %v779_v29 = vadd.f32 %v763_v11, %v743_v39  ;;  %v1003_v5 = vmul.f32 %v1145_v3, %v1727_v6  ;;  %v152_v20 = vmul.f32 %v1168_v17, %v2643_v45  ;;  %v2644_v53 = vld [vmem:[#allocation11_spill] sm:$0xff]  ;;  %v188_v25 = vmul.f32 %v1171_v18, %v1736_v36 }
  0x5b   : > { %v264_v46 = vmul.f32 %v1174_v19, %v2644_v53  ;;  %v947_v59 = vadd.f32 %v931_v41, %v911_v63  ;;  %v96_v10 = vadd.f32 %v80_v58, %v60_v52  ;;  %v284_v37 = vmul.f32 %v2646_v47, %v2645_v38  ;;  %v1751_v53 = vld [vmem:[%s1195_s21 + $0xa9] sm:$0xff]  ;;  %v2650_v52 = vld [vmem:[#allocation14_spill] sm:$0xff] }
  0x5c   : > { %v627_v11 = vadd.f32 %v611_v55, %v203_v1  ;;  %v815_v39 = vadd.f32 %v799_v16, %v779_v29  ;;  %v320_v6 = vmul.f32 %v1181_v21, %v2647_v62  ;;  %v356_v45 = vmul.f32 %v1184_v22, %v2648_v57  ;;  %2649 = vst [vmem:[#allocation9_spill] sm:$0xff] %v1751_v53  ;;  %v2651_v16 = vld [vmem:[#allocation16_spill] sm:$0xff]  ;;  %v2652_v29 = vld [vmem:[#allocation42_spill] sm:$0xff] }
  0x5d   : > { %v983_v50 = vadd.f32 %v967_v9, %v947_v59  ;;  %v132_v2 = vadd.f32 %v116_v44, %v96_v10  ;;  %v300_v41 = vadd.f32 %v284_v37, %v264_v46  ;;  %v468_v63 = vmul.f32 %v1190_v24, %v2650_v52  ;;  %v2653_v59 = vld [vmem:[#allocation8_spill] sm:$0xff]  ;;  %v2656_v52 = vld [vmem:[#allocation19_spill] sm:$0xff] }
  0x5e   : > { %v831_v58 = vadd.f32 %v815_v39, %v407_v12  ;;  %v392_v1 = vmul.f32 %v1187_v23, %v1751_v53  ;;  %v488_v55 = vmul.f32 %v2611_v43, %v2651_v16  ;;  %v524_v62 = vmul.f32 %v1201_v26, %v2652_v29  ;;  %v1764_v46 = vld [vmem:[%s1195_s21 + $0xaa] sm:$0xff]  ;;  %v2655_v12 = vld [vmem:[#allocation18_spill] sm:$0xff] }
  0x5f   : > { %v1019_v57 = vadd.f32 %v1003_v5, %v983_v50  ;;  %v168_v9 = vadd.f32 %v152_v20, %v132_v2  ;;  %v336_v44 = vadd.f32 %v320_v6, %v300_v41  ;;  %v560_v37 = vmul.f32 %v1204_v27, %v2653_v59  ;;  %2654 = vst [vmem:[#allocation11_spill] sm:$0xff] %v1764_v46  ;;  %v2657_v16 = vld [vmem:[#allocation15_spill] sm:$0xff]  ;;  %v2659_v41 = vld [vmem:[#allocation13_spill] sm:$0xff] }
  0x60   : > { %v504_v10 = vadd.f32 %v488_v55, %v468_v63  ;;  %v672_v39 = vmul.f32 %v1218_v32, %v2655_v12  ;;  %v692_v53 = vmul.f32 %v1221_v33, %v2656_v52  ;;  %v728_v38 = vmul.f32 %v1224_v34, %v2657_v16  ;;  %v1775_v5 = vld [vmem:[%s1195_s21 + $0xab] sm:$0xff] }
  0x61   : > { %v1035_v36 = vadd.f32 %v1019_v57, %v627_v11  ;;  %v204_v29 = vadd.f32 %v188_v25, %v168_v9  ;;  %v372_v50 = vadd.f32 %v356_v45, %v336_v44  ;;  %v596_v2 = vmul.f32 %v2578_v31, %v1764_v46  ;;  %2658 = vst [vmem:[#allocation5_spill] sm:$0xff] %v1775_v5  ;;  %v2660_v55 = vld [vmem:[#allocation23_spill] sm:$0xff]  ;;  %v2661_v25 = vld [vmem:[#allocation26_spill] sm:$0xff]  ;;  %v2667_v16 = vld [vmem:[#allocation20_spill] sm:$0xff] }
  0x62   : > { %v540_v6 = vadd.f32 %v524_v62, %v504_v10  ;;  %v708_v20 = vadd.f32 %v692_v53, %v672_v39  ;;  %v764_v63 = vmul.f32 %v1227_v35, %v2659_v41  ;;  %v876_v12 = vmul.f32 %v1259_v49, %v2660_v55  ;;  %v2662_v11 = vld [vmem:[#allocation7_spill] sm:$0xff]  ;;  %v2663_v10 = vld [vmem:[#allocation6_spill] sm:$0xff] }
  0x63   : > { %v1051_v52 = vadd.f32 %v1035_v36, %v831_v58  ;;  %v800_v57 = vmul.f32 %v1242_v42, %v1775_v5  ;;  %v896_v45 = vmul.f32 %v1273_v56, %v2661_v25  ;;  %v932_v9 = vmul.f32 %v1295_v8, %v2662_v11  ;;  %v1791_v41 = vld [vmem:[%s1195_s21 + $0xac] sm:$0xff] }
  0x64   : > { %v408_v62 = vadd.f32 %v392_v1, %v372_v50  ;;  %v576_v44 = vadd.f32 %v560_v37, %v540_v6  ;;  %v744_v53 = vadd.f32 %v728_v38, %v708_v20  ;;  %v968_v39 = vmul.f32 %v1343_v7, %v2663_v10  ;;  %2664 = vst [vmem:[#allocation14_spill] sm:$0xff] %v1791_v41  ;;  %v2665_v58 = vld [vmem:[#allocation27_spill] sm:$0xff]  ;;  %v2666_v5 = vld [vmem:[#allocation28_spill] sm:$0xff]  ;;  %v2668_v50 = vld [vmem:[#allocation17_spill] sm:$0xff] }
  0x65   : > { %1069 = vst [vmem:[%s1435_s25 + $0x28] sm:$0xff] %v1051_v52  ;;  %v912_v36 = vadd.f32 %v896_v45, %v876_v12  ;;  %v61_v55 = vmul.f32 %v1156_v13, %v2665_v58  ;;  %v81_v25 = vmul.f32 %v1159_v14, %v2666_v5  ;;  %v117_v11 = vmul.f32 %v1162_v15, %v2667_v16  ;;  %v1804_v20 = vld [vmem:[%s1195_s21 + $0xb0] sm:$0xff]  ;;  %v2670_v45 = vld [vmem:[#allocation31_spill] sm:$0xff] }
  0x66   : > { %v612_v1 = vadd.f32 %v596_v2, %v576_v44  ;;  %v780_v37 = vadd.f32 %v764_v63, %v744_v53  ;;  %v1004_v38 = vmul.f32 %v1145_v3, %v1791_v41  ;;  %v153_v52 = vmul.f32 %v1168_v17, %v2668_v50  ;;  %2669 = vst [vmem:[#allocation18_spill] sm:$0xff] %v1804_v20  ;;  %v1815_v53 = vld [vmem:[%s1195_s21 + $0xb1] sm:$0xff] }
  0x67   : > { %v948_v6 = vadd.f32 %v932_v9, %v912_v36  ;;  %v97_v12 = vadd.f32 %v81_v25, %v61_v55  ;;  %v265_v58 = vmul.f32 %v1174_v19, %v2670_v45  ;;  %v285_v5 = vmul.f32 %v2646_v47, %v2632_v0  ;;  %2671 = vst [vmem:[#allocation23_spill] sm:$0xff] %v1815_v53 }
  0x68   : > { %v628_v16 = vadd.f32 %v612_v1, %v204_v29  ;;  %v816_v10 = vadd.f32 %v800_v57, %v780_v37  ;;  %v189_v2 = vmul.f32 %v1171_v18, %v1804_v20  ;;  %v321_v63 = vmul.f32 %v1181_v21, %v2633_v4 }
  0x69   : > { %v984_v44 = vadd.f32 %v968_v39, %v948_v6  ;;  %v133_v9 = vadd.f32 %v117_v11, %v97_v12  ;;  %v301_v25 = vadd.f32 %v285_v5, %v265_v58  ;;  %v357_v36 = vmul.f32 %v1184_v22, %v1685_v48  ;;  %v1828_v6 = vld [vmem:[%s1195_s21 + $0xb2] sm:$0xff] }
  0x6a   : > { %v393_v55 = vmul.f32 %v1187_v23, %v1815_v53  ;;  %v469_v29 = vmul.f32 %v1190_v24, %v2598_v30  ;;  %v489_v57 = vmul.f32 %v2611_v43, %v2599_v28  ;;  %v525_v1 = vmul.f32 %v1201_v26, %v1564_v40  ;;  %2672 = vst [vmem:[#allocation27_spill] sm:$0xff] %v1828_v6 }
  0x6b   : > { %v832_v11 = vadd.f32 %v816_v10, %v408_v62  ;;  %v1020_v39 = vadd.f32 %v1004_v38, %v984_v44  ;;  %v169_v37 = vadd.f32 %v153_v52, %v133_v9  ;;  %v337_v5 = vadd.f32 %v321_v63, %v301_v25  ;;  %v1841_v63 = vld [vmem:[%s1195_s21 + $0xb3] sm:$0xff] }
  0x6c   : > { %v505_v12 = vadd.f32 %v489_v57, %v469_v29  ;;  %v561_v45 = vmul.f32 %v1204_v27, %v1698_v51  ;;  %v673_v30 = vmul.f32 %v1218_v32, %v1425_v61  ;;  %v693_v58 = vmul.f32 %v1221_v33, %v1442_v54  ;;  %2673 = vst [vmem:[#allocation31_spill] sm:$0xff] %v1841_v63  ;;  %v2674_v9 = vld [vmem:[#allocation29_spill] sm:$0xff]  ;;  %v2676_v57 = vld [vmem:[#allocation39_spill] sm:$0xff] }
  0x6d   : > { %v1036_v28 = vadd.f32 %v1020_v39, %v628_v16  ;;  %v373_v53 = vadd.f32 %v357_v36, %v337_v5  ;;  %v597_v62 = vmul.f32 %v2578_v31, %v1828_v6  ;;  %v729_v10 = vmul.f32 %v1224_v34, %v1577_v60  ;;  %v2675_v36 = vld [vmem:[#allocation38_spill] sm:$0xff] }
  0x6e   : > { %v205_v38 = vadd.f32 %v189_v2, %v169_v37  ;;  %v541_v52 = vadd.f32 %v525_v1, %v505_v12  ;;  %v709_v44 = vadd.f32 %v693_v58, %v673_v30  ;;  %v765_v61 = vmul.f32 %v1227_v35, %v2674_v9  ;;  %v2677_v37 = vld [vmem:[#allocation30_spill] sm:$0xff]  ;;  %v1855_v30 = vld [vmem:[%s1195_s21 + $0xb4] sm:$0xff] }
  0x6f   : > { %v1052_v25 = vadd.f32 %v1036_v28, %v832_v11  ;;  %v801_v16 = vmul.f32 %v1242_v42, %v1841_v63  ;;  %v877_v29 = vmul.f32 %v1259_v49, %v2675_v36  ;;  %v897_v39 = vmul.f32 %v1273_v56, %v2676_v57  ;;  %2678 = vst [vmem:[#allocation38_spill] sm:$0xff] %v1855_v30  ;;  %v2679_v11 = vld [vmem:[#allocation34_spill] sm:$0xff]  ;;  %v2681_v9 = vld [vmem:[#allocation40_spill] sm:$0xff] }
  0x70   : > { %v409_v5 = vadd.f32 %v393_v55, %v373_v53  ;;  %v577_v2 = vadd.f32 %v561_v45, %v541_v52  ;;  %v745_v1 = vadd.f32 %v729_v10, %v709_v44  ;;  %v933_v12 = vmul.f32 %v1295_v8, %v2677_v37  ;;  %v2680_v63 = vld [vmem:[#allocation10_spill] sm:$0xff]  ;;  %v2682_v45 = vld [vmem:[#allocation35_spill] sm:$0xff] }
  0x71   : > { %1070 = vst [vmem:[%s1435_s25 + $0x30] sm:$0xff] %v1052_v25  ;;  %v913_v28 = vadd.f32 %v897_v39, %v877_v29  ;;  %v969_v58 = vmul.f32 %v1343_v7, %v2679_v11  ;;  %v62_v36 = vmul.f32 %v1156_v13, %v2680_v63  ;;  %v82_v57 = vmul.f32 %v1159_v14, %v2681_v9  ;;  %v1868_v44 = vld [vmem:[%s1195_s21 + $0xc0] sm:$0xff]  ;;  %v2684_v29 = vld [vmem:[#allocation32_spill] sm:$0xff] }
  0x72   : > { %v613_v60 = vadd.f32 %v597_v62, %v577_v2  ;;  %v781_v53 = vadd.f32 %v765_v61, %v745_v1  ;;  %v1005_v55 = vmul.f32 %v1145_v3, %v1855_v30  ;;  %v118_v10 = vmul.f32 %v1162_v15, %v2682_v45  ;;  %2683 = vst [vmem:[#allocation10_spill] sm:$0xff] %v1868_v44  ;;  %v2685_v63 = vld [vmem:[#allocation12_spill] sm:$0xff]  ;;  %v2686_v61 = vld [vmem:[#allocation41_spill] sm:$0xff] }
  0x73   : > { %v949_v52 = vadd.f32 %v933_v12, %v913_v28  ;;  %v98_v25 = vadd.f32 %v82_v57, %v62_v36  ;;  %v154_v39 = vmul.f32 %v1168_v17, %v2684_v29  ;;  %v266_v11 = vmul.f32 %v1174_v19, %v2685_v63  ;;  %v2687_v1 = vld [vmem:[#allocation33_spill] sm:$0xff]  ;;  %v1881_v36 = vld [vmem:[%s1195_s21 + $0xc1] sm:$0xff] }
  0x74   : > { %v817_v9 = vadd.f32 %v801_v16, %v781_v53  ;;  %v190_v62 = vmul.f32 %v1171_v18, %v1868_v44  ;;  %v286_v2 = vmul.f32 %v2646_v47, %v2686_v61  ;;  %v322_v12 = vmul.f32 %v1181_v21, %v2687_v1  ;;  %2688 = vst [vmem:[#allocation12_spill] sm:$0xff] %v1881_v36  ;;  %v2689_v29 = vld [vmem:[#allocation9_spill] sm:$0xff]  ;;  %v2690_v53 = vld [vmem:[#allocation16_spill] sm:$0xff]  ;;  %v2691_v61 = vld [vmem:[#allocation42_spill] sm:$0xff] }
  0x75   : > { %v629_v28 = vadd.f32 %v613_v60, %v205_v38  ;;  %v985_v45 = vadd.f32 %v969_v58, %v949_v52  ;;  %v134_v57 = vadd.f32 %v118_v10, %v98_v25  ;;  %v358_v30 = vmul.f32 %v1184_v22, %v2689_v29  ;;  %v1894_v10 = vld [vmem:[%s1195_s21 + $0xc2] sm:$0xff] }
  0x76   : > { %v302_v63 = vadd.f32 %v286_v2, %v266_v11  ;;  %v394_v16 = vmul.f32 %v1187_v23, %v1881_v36  ;;  %v470_v44 = vmul.f32 %v1190_v24, %v2690_v53  ;;  %v490_v37 = vmul.f32 %v2611_v43, %v2691_v61  ;;  %2692 = vst [vmem:[#allocation16_spill] sm:$0xff] %v1894_v10  ;;  %v2693_v25 = vld [vmem:[#allocation19_spill] sm:$0xff] }
  0x77   : > { %v833_v54 = vadd.f32 %v817_v9, %v409_v5  ;;  %v1021_v1 = vadd.f32 %v1005_v55, %v985_v45  ;;  %v170_v60 = vadd.f32 %v154_v39, %v134_v57  ;;  %v526_v38 = vmul.f32 %v1201_v26, %v2653_v59  ;;  %v2694_v5 = vld [vmem:[#allocation15_spill] sm:$0xff]  ;;  %v2695_v45 = vld [vmem:[#allocation13_spill] sm:$0xff] }
  0x78   : > { %v338_v58 = vadd.f32 %v322_v12, %v302_v63  ;;  %v506_v11 = vadd.f32 %v490_v37, %v470_v44  ;;  %v562_v52 = vmul.f32 %v1204_v27, %v1764_v46  ;;  %v674_v2 = vmul.f32 %v1218_v32, %v2693_v25  ;;  %v2696_v57 = vld [vmem:[#allocation5_spill] sm:$0xff]  ;;  %v1909_v25 = vld [vmem:[%s1195_s21 + $0xc3] sm:$0xff] }
  0x79   : > { %v1037_v53 = vadd.f32 %v1021_v1, %v629_v28  ;;  %v598_v9 = vmul.f32 %v2578_v31, %v1894_v10  ;;  %v694_v55 = vmul.f32 %v1221_v33, %v2694_v5  ;;  %v730_v39 = vmul.f32 %v1224_v34, %v2695_v45  ;;  %2697 = vst [vmem:[#allocation19_spill] sm:$0xff] %v1909_v25  ;;  %v2698_v28 = vld [vmem:[#allocation26_spill] sm:$0xff]  ;;  %v2699_v59 = vld [vmem:[#allocation7_spill] sm:$0xff] }
  0x7a   : > { %v206_v12 = vadd.f32 %v190_v62, %v170_v60  ;;  %v374_v37 = vadd.f32 %v358_v30, %v338_v58  ;;  %v542_v44 = vadd.f32 %v526_v38, %v506_v11  ;;  %v766_v63 = vmul.f32 %v1227_v35, %v2696_v57  ;;  %v2700_v62 = vld [vmem:[#allocation6_spill] sm:$0xff] }
  0x7b   : > { %v1053_v46 = vadd.f32 %v1037_v53, %v833_v54  ;;  %v710_v1 = vadd.f32 %v694_v55, %v674_v2  ;;  %v878_v10 = vmul.f32 %v1259_v49, %v2698_v28  ;;  %v898_v5 = vmul.f32 %v1273_v56, %v2699_v59  ;;  %v1921_v38 = vld [vmem:[%s1195_s21 + $0xc4] sm:$0xff]  ;;  %v2702_v2 = vld [vmem:[#allocation28_spill] sm:$0xff] }
  0x7c   : > { %v410_v61 = vadd.f32 %v394_v16, %v374_v37  ;;  %v578_v45 = vadd.f32 %v562_v52, %v542_v44  ;;  %v802_v30 = vmul.f32 %v1242_v42, %v1909_v25  ;;  %v934_v60 = vmul.f32 %v1295_v8, %v2700_v62  ;;  %2701 = vst [vmem:[#allocation26_spill] sm:$0xff] %v1921_v38  ;;  %v2703_v55 = vld [vmem:[#allocation20_spill] sm:$0xff] }
  0x7d   : > { %1071 = vst [vmem:[%s1435_s25 + $0x38] sm:$0xff] %v1053_v46  ;;  %v746_v54 = vadd.f32 %v730_v39, %v710_v1  ;;  %v914_v58 = vadd.f32 %v898_v5, %v878_v10  ;;  %v970_v11 = vmul.f32 %v1343_v7, %v1791_v41  ;;  %v63_v53 = vmul.f32 %v1156_v13, %v2702_v2  ;;  %v1934_v10 = vld [vmem:[%s1195_s21 + $0xc8] sm:$0xff] }
  0x7e   : > { %v614_v16 = vadd.f32 %v598_v9, %v578_v45  ;;  %v1006_v52 = vmul.f32 %v1145_v3, %v1921_v38  ;;  %v83_v37 = vmul.f32 %v1159_v14, %v2703_v55  ;;  %v119_v46 = vmul.f32 %v1162_v15, %v2668_v50  ;;  %2704 = vst [vmem:[#allocation7_spill] sm:$0xff] %v1934_v10  ;;  %v1949_v55 = vld [vmem:[%s1195_s21 + $0xc9] sm:$0xff] }
  0x7f   : > { %v782_v39 = vadd.f32 %v766_v63, %v746_v54  ;;  %v950_v44 = vadd.f32 %v934_v60, %v914_v58  ;;  %v155_v5 = vmul.f32 %v1168_v17, %v1804_v20  ;;  %v267_v9 = vmul.f32 %v1174_v19, %v2632_v0  ;;  %v2705_v58 = vld [vmem:[#allocation23_spill] sm:$0xff]  ;;  %2706 = vst [vmem:[#allocation28_spill] sm:$0xff] %v1949_v55 }
  0x80   : > { %v99_v45 = vadd.f32 %v83_v37, %v63_v53  ;;  %v191_v1 = vmul.f32 %v1171_v18, %v1934_v10  ;;  %v287_v28 = vmul.f32 %v2646_v47, %v2633_v4  ;;  %v323_v2 = vmul.f32 %v1181_v21, %v1685_v48  ;;  %v2707_v53 = vld [vmem:[#allocation36_spill] sm:$0xff] }
  0x81   : > { %v630_v63 = vadd.f32 %v614_v16, %v206_v12  ;;  %v818_v60 = vadd.f32 %v802_v30, %v782_v39  ;;  %v986_v54 = vadd.f32 %v970_v11, %v950_v44  ;;  %v359_v20 = vmul.f32 %v1184_v22, %v2705_v58 }
  0x82   : > { %v135_v50 = vadd.f32 %v119_v46, %v99_v45  ;;  %v303_v0 = vadd.f32 %v287_v28, %v267_v9  ;;  %v471_v37 = vmul.f32 %v1190_v24, %v2707_v53  ;;  %v491_v4 = vmul.f32 %v2611_v43, %v1564_v40  ;;  %v1962_v9 = vld [vmem:[%s1195_s21 + $0xca] sm:$0xff]  ;;  %v2709_v45 = vld [vmem:[#allocation37_spill] sm:$0xff] }
  0x83   : > { %v834_v10 = vadd.f32 %v818_v60, %v410_v61  ;;  %v1022_v38 = vadd.f32 %v1006_v52, %v986_v54  ;;  %v395_v12 = vmul.f32 %v1187_v23, %v1949_v55  ;;  %v527_v30 = vmul.f32 %v1201_v26, %v1698_v51  ;;  %2708 = vst [vmem:[#allocation36_spill] sm:$0xff] %v1962_v9  ;;  %v2710_v52 = vld [vmem:[#allocation25_spill] sm:$0xff] }
  0x84   : > { %v171_v11 = vadd.f32 %v155_v5, %v135_v50  ;;  %v339_v16 = vadd.f32 %v323_v2, %v303_v0  ;;  %v507_v46 = vadd.f32 %v491_v4, %v471_v37  ;;  %v563_v39 = vmul.f32 %v1204_v27, %v1828_v6  ;;  %v2711_v60 = vld [vmem:[#allocation29_spill] sm:$0xff]  ;;  %v1973_v2 = vld [vmem:[%s1195_s21 + $0xcb] sm:$0xff] }
  0x85   : > { %v1038_v44 = vadd.f32 %v1022_v38, %v630_v63  ;;  %v675_v61 = vmul.f32 %v1218_v32, %v2709_v45  ;;  %v695_v28 = vmul.f32 %v1221_v33, %v2710_v52  ;;  %v731_v54 = vmul.f32 %v1224_v34, %v2711_v60  ;;  %2712 = vst [vmem:[#allocation37_spill] sm:$0xff] %v1973_v2  ;;  %v2713_v0 = vld [vmem:[#allocation31_spill] sm:$0xff] }
  0x86   : > { %v207_v53 = vadd.f32 %v191_v1, %v171_v11  ;;  %v375_v50 = vadd.f32 %v359_v20, %v339_v16  ;;  %v543_v5 = vadd.f32 %v527_v30, %v507_v46  ;;  %v599_v4 = vmul.f32 %v2578_v31, %v1962_v9  ;;  %v2714_v45 = vld [vmem:[#allocation39_spill] sm:$0xff]  ;;  %v2715_v1 = vld [vmem:[#allocation30_spill] sm:$0xff] }
  0x87   : > { %v1054_v38 = vadd.f32 %v1038_v44, %v834_v10  ;;  %v711_v63 = vadd.f32 %v695_v28, %v675_v61  ;;  %v767_v37 = vmul.f32 %v1227_v35, %v2713_v0  ;;  %v879_v52 = vmul.f32 %v1259_v49, %v2714_v45  ;;  %v2716_v11 = vld [vmem:[#allocation34_spill] sm:$0xff]  ;;  %v2718_v28 = vld [vmem:[#allocation40_spill] sm:$0xff] }
  0x88   : > { %v579_v6 = vadd.f32 %v563_v39, %v543_v5  ;;  %v803_v20 = vmul.f32 %v1242_v42, %v1973_v2  ;;  %v899_v30 = vmul.f32 %v1273_v56, %v2715_v1  ;;  %v935_v10 = vmul.f32 %v1295_v8, %v2716_v11  ;;  %v2717_v44 = vld [vmem:[#allocation38_spill] sm:$0xff]  ;;  %v1991_v5 = vld [vmem:[%s1195_s21 + $0xcc] sm:$0xff] }
  0x89   : > { %1072 = vst [vmem:[%s1435_s25 + $0x40] sm:$0xff] %v1054_v38  ;;  %v411_v16 = vadd.f32 %v395_v12, %v375_v50  ;;  %v747_v46 = vadd.f32 %v731_v54, %v711_v63  ;;  %v971_v61 = vmul.f32 %v1343_v7, %v2717_v44  ;;  %v64_v45 = vmul.f32 %v1156_v13, %v2718_v28  ;;  %v2720_v2 = vld [vmem:[#allocation35_spill] sm:$0xff]  ;;  %v2721_v1 = vld [vmem:[#allocation32_spill] sm:$0xff]  ;;  %v2000_v54 = vld [vmem:[%s1195_s21 + $0xd8] sm:$0xff] }
  0x8a   : > { %v615_v39 = vadd.f32 %v599_v4, %v579_v6  ;;  %2719 = vst [vmem:[#allocation39_spill] sm:$0xff] %v1991_v5  ;;  %v915_v0 = vadd.f32 %v899_v30, %v879_v52  ;;  %v84_v60 = vmul.f32 %v1159_v14, %v2720_v2  ;;  %v120_v9 = vmul.f32 %v1162_v15, %v2721_v1  ;;  %v2723_v50 = vld [vmem:[#allocation10_spill] sm:$0xff]  ;;  %v2724_v6 = vld [vmem:[#allocation41_spill] sm:$0xff] }
  0x8b   : > { %v783_v38 = vadd.f32 %v767_v37, %v747_v46  ;;  %v1007_v12 = vmul.f32 %v1145_v3, %v1991_v5  ;;  %2722 = vst [vmem:[#allocation40_spill] sm:$0xff] %v2000_v54  ;;  %v156_v63 = vmul.f32 %v1168_v17, %v2723_v50  ;;  %v268_v4 = vmul.f32 %v1174_v19, %v2724_v6  ;;  %v2725_v2 = vld [vmem:[#allocation33_spill] sm:$0xff] }
  0x8c   : > { %v951_v52 = vadd.f32 %v935_v10, %v915_v0  ;;  %v100_v30 = vadd.f32 %v84_v60, %v64_v45  ;;  %v192_v28 = vmul.f32 %v1171_v18, %v2000_v54  ;;  %v288_v1 = vmul.f32 %v2646_v47, %v2725_v2  ;;  %v2015_v6 = vld [vmem:[%s1195_s21 + $0xd9] sm:$0xff] }
  0x8d   : > { %v631_v37 = vadd.f32 %v615_v39, %v207_v53  ;;  %v819_v46 = vadd.f32 %v803_v20, %v783_v38  ;;  %v324_v5 = vmul.f32 %v1181_v21, %v2689_v29  ;;  %v360_v50 = vmul.f32 %v1184_v22, %v1881_v36  ;;  %2726 = vst [vmem:[#allocation41_spill] sm:$0xff] %v2015_v6  ;;  %v2727_v0 = vld [vmem:[#allocation42_spill] sm:$0xff]  ;;  %v2728_v20 = vld [vmem:[#allocation8_spill] sm:$0xff]  ;;  %v2729_v38 = vld [vmem:[#allocation11_spill] sm:$0xff] }
  0x8e   : > { %v987_v44 = vadd.f32 %v971_v61, %v951_v52  ;;  %v136_v11 = vadd.f32 %v120_v9, %v100_v30  ;;  %v304_v60 = vadd.f32 %v288_v1, %v268_v4  ;;  %v472_v10 = vmul.f32 %v1190_v24, %v2727_v0  ;;  %v2730_v52 = vld [vmem:[#allocation16_spill] sm:$0xff]  ;;  %v2028_v4 = vld [vmem:[%s1195_s21 + $0xda] sm:$0xff] }
  0x8f   : > { %v835_v45 = vadd.f32 %v819_v46, %v411_v16  ;;  %v396_v53 = vmul.f32 %v1187_v23, %v2015_v6  ;;  %v492_v39 = vmul.f32 %v2611_v43, %v2728_v20  ;;  %v528_v29 = vmul.f32 %v1201_v26, %v2729_v38  ;;  %v2731_v16 = vld [vmem:[#allocation15_spill] sm:$0xff]  ;;  %v2732_v0 = vld [vmem:[#allocation13_spill] sm:$0xff] }
  0x90   : > { %v1023_v36 = vadd.f32 %v1007_v12, %v987_v44  ;;  %v172_v61 = vadd.f32 %v156_v63, %v136_v11  ;;  %v340_v9 = vadd.f32 %v324_v5, %v304_v60  ;;  %v564_v1 = vmul.f32 %v1204_v27, %v2730_v52  ;;  %v2039_v12 = vld [vmem:[%s1195_s21 + $0xdb] sm:$0xff] }
  0x91   : > { %v508_v30 = vadd.f32 %v492_v39, %v472_v10  ;;  %v676_v46 = vmul.f32 %v1218_v32, %v2731_v16  ;;  %v696_v6 = vmul.f32 %v1221_v33, %v2732_v0  ;;  %v732_v20 = vmul.f32 %v1224_v34, %v2696_v57  ;;  %2733 = vst [vmem:[#allocation42_spill] sm:$0xff] %v2039_v12  ;;  %v2737_v16 = vld [vmem:[#allocation17_spill] sm:$0xff] }
  0x92   : > { %v1039_v2 = vadd.f32 %v1023_v36, %v631_v37  ;;  %v208_v38 = vadd.f32 %v192_v28, %v172_v61  ;;  %v376_v11 = vadd.f32 %v360_v50, %v340_v9  ;;  %v600_v44 = vmul.f32 %v2578_v31, %v2028_v4  ;;  %v2734_v61 = vld [vmem:[#allocation26_spill] sm:$0xff] }
  0x93   : > { %v544_v5 = vadd.f32 %v528_v29, %v508_v30  ;;  %v712_v63 = vadd.f32 %v696_v6, %v676_v46  ;;  %v768_v60 = vmul.f32 %v1227_v35, %v1909_v25  ;;  %v880_v10 = vmul.f32 %v1259_v49, %v2699_v59  ;;  %v2055_v30 = vld [vmem:[%s1195_s21 + $0xdc] sm:$0xff] }
  0x94   : > { %v1055_v39 = vadd.f32 %v1039_v2, %v835_v45  ;;  %v804_v36 = vmul.f32 %v1242_v42, %v2039_v12  ;;  %v900_v50 = vmul.f32 %v1273_v56, %v2700_v62  ;;  %v936_v28 = vmul.f32 %v1295_v8, %v1791_v41  ;;  %2735 = vst [vmem:[#allocation16_spill] sm:$0xff] %v2055_v30  ;;  %v2736_v2 = vld [vmem:[#allocation20_spill] sm:$0xff]  ;;  %v2738_v62 = vld [vmem:[#allocation18_spill] sm:$0xff] }
  0x95   : > { %v412_v29 = vadd.f32 %v396_v53, %v376_v11  ;;  %v580_v37 = vadd.f32 %v564_v1, %v544_v5  ;;  %v748_v6 = vadd.f32 %v732_v20, %v712_v63  ;;  %v972_v9 = vmul.f32 %v1343_v7, %v2734_v61  ;;  %v2739_v11 = vld [vmem:[#allocation7_spill] sm:$0xff] }
  0x96   : > { %1073 = vst [vmem:[%s1435_s25 + $0x48] sm:$0xff] %v1055_v39  ;;  %v916_v59 = vadd.f32 %v900_v50, %v880_v10  ;;  %v65_v45 = vmul.f32 %v1156_v13, %v2736_v2  ;;  %v85_v46 = vmul.f32 %v1159_v14, %v2737_v16  ;;  %v121_v41 = vmul.f32 %v1162_v15, %v2738_v62  ;;  %v2068_v10 = vld [vmem:[%s1195_s21 + $0xe0] sm:$0xff] }
  0x97   : > { %v616_v53 = vadd.f32 %v600_v44, %v580_v37  ;;  %v784_v1 = vadd.f32 %v768_v60, %v748_v6  ;;  %v1008_v20 = vmul.f32 %v1145_v3, %v2055_v30  ;;  %v157_v5 = vmul.f32 %v1168_v17, %v2739_v11  ;;  %2740 = vst [vmem:[#allocation15_spill] sm:$0xff] %v2068_v10  ;;  %v2741_v50 = vld [vmem:[#allocation22_spill] sm:$0xff] }
  0x98   : > { %v952_v63 = vadd.f32 %v936_v28, %v916_v59  ;;  %v101_v39 = vadd.f32 %v85_v46, %v65_v45  ;;  %v269_v2 = vmul.f32 %v1174_v19, %v2741_v50  ;;  %v289_v16 = vmul.f32 %v2646_v47, %v1685_v48  ;;  %v2079_v6 = vld [vmem:[%s1195_s21 + $0xe1] sm:$0xff] }
  0x99   : > { %v632_v62 = vadd.f32 %v616_v53, %v208_v38  ;;  %v820_v61 = vadd.f32 %v804_v36, %v784_v1  ;;  %v193_v44 = vmul.f32 %v1171_v18, %v2068_v10  ;;  %v325_v60 = vmul.f32 %v1181_v21, %v2705_v58  ;;  %2742 = vst [vmem:[#allocation13_spill] sm:$0xff] %v2079_v6  ;;  %v2743_v53 = vld [vmem:[#allocation27_spill] sm:$0xff]  ;;  %v2747_v58 = vld [vmem:[#allocation29_spill] sm:$0xff] }
  0x9a   : > { %v988_v37 = vadd.f32 %v972_v9, %v952_v63  ;;  %v137_v28 = vadd.f32 %v121_v41, %v101_v39  ;;  %v305_v59 = vadd.f32 %v289_v16, %v269_v2  ;;  %v361_v45 = vmul.f32 %v1184_v22, %v1949_v55  ;;  %v2092_v39 = vld [vmem:[%s1195_s21 + $0xe2] sm:$0xff]  ;;  %v2745_v2 = vld [vmem:[#allocation36_spill] sm:$0xff]  ;;  %v2746_v55 = vld [vmem:[#allocation25_spill] sm:$0xff] }
  0x9b   : > { %v397_v46 = vmul.f32 %v1187_v23, %v2079_v6  ;;  %v473_v38 = vmul.f32 %v1190_v24, %v1564_v40  ;;  %v493_v36 = vmul.f32 %v2611_v43, %v1698_v51  ;;  %v529_v1 = vmul.f32 %v1201_v26, %v2743_v53  ;;  %2744 = vst [vmem:[#allocation20_spill] sm:$0xff] %v2092_v39 }
  0x9c   : > { %v836_v41 = vadd.f32 %v820_v61, %v412_v29  ;;  %v1024_v9 = vadd.f32 %v1008_v20, %v988_v37  ;;  %v173_v63 = vadd.f32 %v157_v5, %v137_v28  ;;  %v341_v16 = vadd.f32 %v325_v60, %v305_v59  ;;  %v2748_v61 = vld [vmem:[#allocation31_spill] sm:$0xff]  ;;  %v2750_v59 = vld [vmem:[#allocation37_spill] sm:$0xff] }
  0x9d   : > { %v509_v50 = vadd.f32 %v493_v36, %v473_v38  ;;  %v565_v6 = vmul.f32 %v1204_v27, %v2745_v2  ;;  %v677_v40 = vmul.f32 %v1218_v32, %v2746_v55  ;;  %v697_v51 = vmul.f32 %v1221_v33, %v2747_v58  ;;  %v2105_v37 = vld [vmem:[%s1195_s21 + $0xe3] sm:$0xff] }
  0x9e   : > { %v1040_v10 = vadd.f32 %v1024_v9, %v632_v62  ;;  %v377_v48 = vadd.f32 %v361_v45, %v341_v16  ;;  %v601_v29 = vmul.f32 %v2578_v31, %v2092_v39  ;;  %v733_v20 = vmul.f32 %v1224_v34, %v2748_v61  ;;  %2749 = vst [vmem:[#allocation22_spill] sm:$0xff] %v2105_v37  ;;  %v2751_v45 = vld [vmem:[#allocation30_spill] sm:$0xff] }
  0x9f   : > { %v209_v5 = vadd.f32 %v193_v44, %v173_v63  ;;  %v545_v60 = vadd.f32 %v529_v1, %v509_v50  ;;  %v713_v28 = vadd.f32 %v697_v51, %v677_v40  ;;  %v769_v55 = vmul.f32 %v1227_v35, %v2750_v59  ;;  %v2752_v9 = vld [vmem:[#allocation34_spill] sm:$0xff]  ;;  %v2756_v40 = vld [vmem:[#allocation35_spill] sm:$0xff] }
  0xa0   : > { %v1056_v38 = vadd.f32 %v1040_v10, %v836_v41  ;;  %v805_v62 = vmul.f32 %v1242_v42, %v2105_v37  ;;  %v881_v36 = vmul.f32 %v1259_v49, %v2751_v45  ;;  %v901_v16 = vmul.f32 %v1273_v56, %v2752_v9  ;;  %v2753_v1 = vld [vmem:[#allocation38_spill] sm:$0xff]  ;;  %v2755_v41 = vld [vmem:[#allocation39_spill] sm:$0xff]  ;;  %v2757_v37 = vld [vmem:[#allocation32_spill] sm:$0xff] }
  0xa1   : > { %v413_v58 = vadd.f32 %v397_v46, %v377_v48  ;;  %v581_v61 = vadd.f32 %v565_v6, %v545_v60  ;;  %v749_v44 = vadd.f32 %v733_v20, %v713_v28  ;;  %v937_v63 = vmul.f32 %v1295_v8, %v2753_v1  ;;  %v2119_v51 = vld [vmem:[%s1195_s21 + $0xe4] sm:$0xff]  ;;  %v2136_v1 = vld [vmem:[%s1195_s21 + $0xf0] sm:$0xff] }
  0xa2   : > { %1074 = vst [vmem:[%s1435_s25 + $0x50] sm:$0xff] %v1056_v38  ;;  %2754 = vst [vmem:[#allocation27_spill] sm:$0xff] %v2119_v51  ;;  %v917_v10 = vadd.f32 %v901_v16, %v881_v36  ;;  %v973_v50 = vmul.f32 %v1343_v7, %v2755_v41  ;;  %v66_v45 = vmul.f32 %v1156_v13, %v2756_v40  ;;  %v2758_v20 = vld [vmem:[#allocation10_spill] sm:$0xff]  ;;  %v2759_v16 = vld [vmem:[#allocation33_spill] sm:$0xff] }
  0xa3   : > { %v86_v9 = vmul.f32 %v1159_v14, %v2757_v37  ;;  %v617_v48 = vadd.f32 %v601_v29, %v581_v61  ;;  %v785_v6 = vadd.f32 %v769_v55, %v749_v44  ;;  %v1009_v46 = vmul.f32 %v1145_v3, %v2119_v51  ;;  %v2760_v29 = vld [vmem:[#allocation9_spill] sm:$0xff]  ;;  %v2761_v55 = vld [vmem:[#allocation12_spill] sm:$0xff] }
  0xa4   : > { %v122_v60 = vmul.f32 %v1162_v15, %v2758_v20  ;;  %v953_v28 = vadd.f32 %v937_v63, %v917_v10  ;;  %v158_v36 = vmul.f32 %v1168_v17, %v2000_v54  ;;  %v270_v41 = vmul.f32 %v1174_v19, %v2759_v16  ;;  %v2764_v54 = vld [vmem:[#allocation11_spill] sm:$0xff] }
  0xa5   : > { %v102_v38 = vadd.f32 %v86_v9, %v66_v45  ;;  %v821_v40 = vadd.f32 %v805_v62, %v785_v6  ;;  %v290_v61 = vmul.f32 %v2646_v47, %v2760_v29  ;;  %v326_v44 = vmul.f32 %v1181_v21, %v2761_v55  ;;  %v2762_v45 = vld [vmem:[#allocation41_spill] sm:$0xff]  ;;  %v2763_v6 = vld [vmem:[#allocation8_spill] sm:$0xff] }
  0xa6   : > { %v633_v37 = vadd.f32 %v617_v48, %v209_v5  ;;  %v989_v20 = vadd.f32 %v973_v50, %v953_v28  ;;  %v194_v9 = vmul.f32 %v1171_v18, %v2136_v1  ;;  %v362_v62 = vmul.f32 %v1184_v22, %v2762_v45  ;;  %v2153_v50 = vld [vmem:[%s1195_s21 + $0xf1] sm:$0xff] }
  0xa7   : > { %v138_v63 = vadd.f32 %v122_v60, %v102_v38  ;;  %v306_v10 = vadd.f32 %v290_v61, %v270_v41  ;;  %v474_v16 = vmul.f32 %v1190_v24, %v2763_v6  ;;  %v494_v29 = vmul.f32 %v2611_v43, %v2764_v54  ;;  %v2766_v6 = vld [vmem:[#allocation14_spill] sm:$0xff] }
  0xa8   : > { %v837_v51 = vadd.f32 %v821_v40, %v413_v58  ;;  %v1025_v59 = vadd.f32 %v1009_v46, %v989_v20  ;;  %v530_v5 = vmul.f32 %v1201_v26, %v2730_v52  ;;  %v566_v60 = vmul.f32 %v1204_v27, %v2028_v4  ;;  %v2162_v46 = vld [vmem:[%s1195_s21 + $0xf2] sm:$0xff] }
  0xa9   : > { %v174_v55 = vadd.f32 %v158_v36, %v138_v63  ;;  %v342_v48 = vadd.f32 %v326_v44, %v306_v10  ;;  %v510_v41 = vadd.f32 %v494_v29, %v474_v16  ;;  %v678_v28 = vmul.f32 %v1218_v32, %v2732_v0  ;;  %v2765_v63 = vld [vmem:[#allocation6_spill] sm:$0xff] }
  0xaa   : > { %v1041_v38 = vadd.f32 %v1025_v59, %v633_v37  ;;  %v398_v58 = vmul.f32 %v1187_v23, %v2153_v50  ;;  %v698_v20 = vmul.f32 %v1221_v33, %v2696_v57  ;;  %v734_v36 = vmul.f32 %v1224_v34, %v1909_v25  ;;  %v2173_v59 = vld [vmem:[%s1195_s21 + $0xf3] sm:$0xff] }
  0xab   : > { %v378_v40 = vadd.f32 %v362_v62, %v342_v48  ;;  %v546_v29 = vadd.f32 %v530_v5, %v510_v41  ;;  %v602_v61 = vmul.f32 %v2578_v31, %v2162_v46  ;;  %v770_v0 = vmul.f32 %v1227_v35, %v2039_v12  ;;  %v2767_v48 = vld [vmem:[#allocation26_spill] sm:$0xff] }
  0xac   : > { %v1057_v37 = vadd.f32 %v1041_v38, %v837_v51  ;;  %v714_v44 = vadd.f32 %v698_v20, %v678_v28  ;;  %v882_v10 = vmul.f32 %v1259_v49, %v2765_v63  ;;  %v902_v16 = vmul.f32 %v1273_v56, %v2766_v6  ;;  %v2768_v20 = vld [vmem:[#allocation17_spill] sm:$0xff] }
  0xad   : > { %v210_v25 = vadd.f32 %v194_v9, %v174_v55  ;;  %v582_v62 = vadd.f32 %v566_v60, %v546_v29  ;;  %v806_v5 = vmul.f32 %v1242_v42, %v2173_v59  ;;  %v938_v41 = vmul.f32 %v1295_v8, %v2767_v48  ;;  %v2189_v55 = vld [vmem:[%s1195_s21 + $0xf4] sm:$0xff]  ;;  %v2770_v9 = vld [vmem:[#allocation18_spill] sm:$0xff] }
  0xae   : > { %1075 = vst [vmem:[%s1435_s25 + $0x58] sm:$0xff] %v1057_v37  ;;  %v750_v51 = vadd.f32 %v734_v36, %v714_v44  ;;  %v918_v38 = vadd.f32 %v902_v16, %v882_v10  ;;  %v974_v28 = vmul.f32 %v1343_v7, %v2055_v30  ;;  %v67_v63 = vmul.f32 %v1156_v13, %v2768_v20  ;;  %v2771_v10 = vld [vmem:[#allocation21_spill] sm:$0xff]  ;;  %v2774_v30 = vld [vmem:[#allocation28_spill] sm:$0xff] }
  0xaf   : > { %v414_v12 = vadd.f32 %v398_v58, %v378_v40  ;;  %v618_v57 = vadd.f32 %v602_v61, %v582_v62  ;;  %2769 = vst [vmem:[#allocation25_spill] sm:$0xff] %v2189_v55  ;;  %v87_v60 = vmul.f32 %v1159_v14, %v2770_v9  ;;  %v123_v29 = vmul.f32 %v1162_v15, %v2739_v11  ;;  %v2772_v58 = vld [vmem:[#allocation15_spill] sm:$0xff] }
  0xb0   : > { %v786_v37 = vadd.f32 %v770_v0, %v750_v51  ;;  %v954_v36 = vadd.f32 %v938_v41, %v918_v38  ;;  %v1010_v44 = vmul.f32 %v1145_v3, %v2189_v55  ;;  %v271_v16 = vmul.f32 %v1174_v19, %v2771_v10  ;;  %v2773_v61 = vld [vmem:[#allocation23_spill] sm:$0xff]  ;;  %v2775_v41 = vld [vmem:[#allocation13_spill] sm:$0xff]  ;;  %v2776_v10 = vld [vmem:[#allocation24_spill] sm:$0xff] }
  0xb1   : > { %v103_v20 = vadd.f32 %v87_v60, %v67_v63  ;;  %v159_v40 = vmul.f32 %v1168_v17, %v2772_v58  ;;  %v291_v62 = vmul.f32 %v2646_v47, %v2773_v61  ;;  %v327_v9 = vmul.f32 %v1181_v21, %v2774_v30  ;;  %v2208_v38 = vld [vmem:[%s1195_s21 + $0xf8] sm:$0xff] }
  0xb2   : > { %v634_v48 = vadd.f32 %v618_v57, %v210_v25  ;;  %v822_v11 = vadd.f32 %v806_v5, %v786_v37  ;;  %v990_v0 = vadd.f32 %v974_v28, %v954_v36  ;;  %v363_v51 = vmul.f32 %v1184_v22, %v2775_v41 }
  0xb3   : > { %v139_v63 = vadd.f32 %v123_v29, %v103_v20  ;;  %v307_v60 = vadd.f32 %v291_v62, %v271_v16  ;;  %v475_v58 = vmul.f32 %v1190_v24, %v2776_v10  ;;  %v495_v61 = vmul.f32 %v2611_v43, %v2743_v53  ;;  %v2221_v16 = vld [vmem:[%s1195_s21 + $0xf9] sm:$0xff] }
  0xb4   : > { %v838_v55 = vadd.f32 %v822_v11, %v414_v12  ;;  %v1026_v30 = vadd.f32 %v1010_v44, %v990_v0  ;;  %v195_v57 = vmul.f32 %v1171_v18, %v2208_v38  ;;  %v531_v25 = vmul.f32 %v1201_v26, %v2745_v2  ;;  %v2224_v20 = vld [vmem:[%s1195_s21 + $0xfa] sm:$0xff]  ;;  %v2779_v44 = vld [vmem:[#allocation31_spill] sm:$0xff] }
  0xb5   : > { %v175_v5 = vadd.f32 %v159_v40, %v139_v63  ;;  %v343_v28 = vadd.f32 %v327_v9, %v307_v60  ;;  %v511_v37 = vadd.f32 %v495_v61, %v475_v58  ;;  %v567_v29 = vmul.f32 %v1204_v27, %v2092_v39  ;;  %2777 = vst [vmem:[#allocation30_spill] sm:$0xff] %v2224_v20  ;;  %v2778_v12 = vld [vmem:[#allocation29_spill] sm:$0xff]  ;;  %v2781_v60 = vld [vmem:[#allocation22_spill] sm:$0xff] }
  0xb6   : > { %v1042_v36 = vadd.f32 %v1026_v30, %v634_v48  ;;  %v679_v11 = vmul.f32 %v1218_v32, %v2778_v12  ;;  %v699_v62 = vmul.f32 %v1221_v33, %v2779_v44  ;;  %v2780_v0 = vld [vmem:[#allocation37_spill] sm:$0xff]  ;;  %v399_v40 = vmul.f32 %v1187_v23, %v2221_v16  ;;  %v2782_v12 = vld [vmem:[#allocation34_spill] sm:$0xff] }
  0xb7   : > { %v735_v9 = vmul.f32 %v1224_v34, %v2780_v0  ;;  %v379_v58 = vadd.f32 %v363_v51, %v343_v28  ;;  %v547_v30 = vadd.f32 %v531_v25, %v511_v37  ;;  %v603_v48 = vmul.f32 %v2578_v31, %v2224_v20  ;;  %v2241_v0 = vld [vmem:[%s1195_s21 + $0xfb] sm:$0xff]  ;;  %v2785_v25 = vld [vmem:[#allocation39_spill] sm:$0xff] }
  0xb8   : > { %v1058_v61 = vadd.f32 %v1042_v36, %v838_v55  ;;  %v715_v63 = vadd.f32 %v699_v62, %v679_v11  ;;  %v771_v10 = vmul.f32 %v1227_v35, %v2781_v60  ;;  %v883_v44 = vmul.f32 %v1259_v49, %v2782_v12  ;;  %2783 = vst [vmem:[#allocation35_spill] sm:$0xff] %v2241_v0  ;;  %v2784_v51 = vld [vmem:[#allocation38_spill] sm:$0xff]  ;;  %v2786_v11 = vld [vmem:[#allocation27_spill] sm:$0xff]  ;;  %v2787_v12 = vld [vmem:[#allocation32_spill] sm:$0xff] }
  0xb9   : > { %v211_v39 = vadd.f32 %v195_v57, %v175_v5  ;;  %v583_v2 = vadd.f32 %v567_v29, %v547_v30  ;;  %v903_v28 = vmul.f32 %v1273_v56, %v2784_v51  ;;  %v939_v37 = vmul.f32 %v1295_v8, %v2785_v25  ;;  %v2255_v29 = vld [vmem:[%s1195_s21 + $0xfc] sm:$0xff]  ;;  %v2789_v25 = vld [vmem:[#allocation40_spill] sm:$0xff] }
  0xba   : > { %1076 = vst [vmem:[%s1435_s25 + $0x60] sm:$0xff] %v1058_v61  ;;  %v751_v55 = vadd.f32 %v735_v9, %v715_v63  ;;  %v807_v36 = vmul.f32 %v1242_v42, %v2241_v0  ;;  %v975_v62 = vmul.f32 %v1343_v7, %v2786_v11  ;;  %v68_v57 = vmul.f32 %v1156_v13, %v2787_v12  ;;  %v2788_v51 = vld [vmem:[#allocation10_spill] sm:$0xff]  ;;  %v2790_v20 = vld [vmem:[#allocation9_spill] sm:$0xff] }
  0xbb   : > { %v619_v5 = vadd.f32 %v603_v48, %v583_v2  ;;  %v919_v30 = vadd.f32 %v903_v28, %v883_v44  ;;  %v88_v60 = vmul.f32 %v1159_v14, %v2788_v51  ;;  %v124_v61 = vmul.f32 %v1162_v15, %v2789_v25  ;;  %v48_v2 = vld [vmem:[%s1195_s21 + $0x108] sm:$0xff]  ;;  %v2791_v51 = vld [vmem:[#allocation12_spill] sm:$0xff] }
  0xbc   : > { %v415_v9 = vadd.f32 %v399_v40, %v379_v58  ;;  %v787_v63 = vadd.f32 %v771_v10, %v751_v55  ;;  %v1011_v0 = vmul.f32 %v1145_v3, %v2255_v29  ;;  %v272_v11 = vmul.f32 %v1174_v19, %v2790_v20 }
  0xbd   : > { %v955_v12 = vadd.f32 %v939_v37, %v919_v30  ;;  %v104_v48 = vadd.f32 %v88_v60, %v68_v57  ;;  %v160_v44 = vmul.f32 %v1168_v17, %v2136_v1  ;;  %v292_v28 = vmul.f32 %v2646_v47, %v2791_v51  ;;  %v252_v30 = vld [vmem:[%s1195_s21 + $0x109] sm:$0xff] }
  0xbe   : > { %v635_v25 = vadd.f32 %v619_v5, %v211_v39  ;;  %v823_v58 = vadd.f32 %v807_v36, %v787_v63  ;;  %v328_v40 = vmul.f32 %v1181_v21, %v2762_v45  ;;  %v364_v10 = vmul.f32 %v1184_v22, %v2153_v50  ;;  %v456_v51 = vld [vmem:[%s1195_s21 + $0x10a] sm:$0xff]  ;;  %v2792_v5 = vld [vmem:[#allocation5_spill] sm:$0xff] }
  0xbf   : > { %v991_v20 = vadd.f32 %v975_v62, %v955_v12  ;;  %v140_v55 = vadd.f32 %v124_v61, %v104_v48  ;;  %v308_v37 = vadd.f32 %v292_v28, %v272_v11  ;;  %v476_v60 = vmul.f32 %v1190_v24, %v2764_v54  ;;  %v2794_v12 = vld [vmem:[#allocation42_spill] sm:$0xff] }
  0xc0   : > { %v839_v57 = vadd.f32 %v823_v58, %v415_v9  ;;  %v196_v1 = vmul.f32 %v1171_v18, %v48_v2  ;;  %v496_v39 = vmul.f32 %v2611_v43, %v2730_v52  ;;  %v532_v45 = vmul.f32 %v1201_v26, %v2028_v4  ;;  %v2793_v9 = vld [vmem:[#allocation19_spill] sm:$0xff] }
  0xc1   : > { %v1027_v36 = vadd.f32 %v1011_v0, %v991_v20  ;;  %v176_v50 = vadd.f32 %v160_v44, %v140_v55  ;;  %v344_v62 = vadd.f32 %v328_v40, %v308_v37  ;;  %v568_v11 = vmul.f32 %v1204_v27, %v2162_v46  ;;  %v660_v44 = vld [vmem:[%s1195_s21 + $0x10b] sm:$0xff] }
  0xc2   : > { %v512_v54 = vadd.f32 %v496_v39, %v476_v60  ;;  %v680_v61 = vmul.f32 %v1218_v32, %v2792_v5  ;;  %v700_v63 = vmul.f32 %v1221_v33, %v2793_v9  ;;  %v736_v52 = vmul.f32 %v1224_v34, %v2794_v12  ;;  %v864_v37 = vld [vmem:[%s1195_s21 + $0x10c] sm:$0xff]  ;;  %v2795_v60 = vld [vmem:[#allocation26_spill] sm:$0xff] }
  0xc3   : > { %v1043_v2 = vadd.f32 %v1027_v36, %v635_v25  ;;  %v380_v48 = vadd.f32 %v364_v10, %v344_v62  ;;  %v400_v4 = vmul.f32 %v1187_v23, %v252_v30  ;;  %v604_v0 = vmul.f32 %v2578_v31, %v456_v51  ;;  %v2796_v10 = vld [vmem:[#allocation16_spill] sm:$0xff]  ;;  %v2797_v36 = vld [vmem:[#allocation25_spill] sm:$0xff] }
  0xc4   : > { %v548_v46 = vadd.f32 %v532_v45, %v512_v54  ;;  %v716_v28 = vadd.f32 %v700_v63, %v680_v61  ;;  %v772_v58 = vmul.f32 %v1227_v35, %v2173_v59  ;;  %v884_v40 = vmul.f32 %v1259_v49, %v2766_v6  ;;  %v2798_v6 = vld [vmem:[#allocation18_spill] sm:$0xff]  ;;  %v2800_v54 = vld [vmem:[#allocation15_spill] sm:$0xff] }
  0xc5   : > { %v1059_v20 = vadd.f32 %v1043_v2, %v839_v57  ;;  %v212_v55 = vadd.f32 %v196_v1, %v176_v50  ;;  %v904_v25 = vmul.f32 %v1273_v56, %v2795_v60  ;;  %v940_v30 = vmul.f32 %v1295_v8, %v2796_v10  ;;  %v2799_v1 = vld [vmem:[#allocation7_spill] sm:$0xff] }
  0xc6   : > { %v584_v51 = vadd.f32 %v568_v11, %v548_v46  ;;  %v752_v39 = vadd.f32 %v736_v52, %v716_v28  ;;  %v808_v45 = vmul.f32 %v1242_v42, %v660_v44  ;;  %v976_v59 = vmul.f32 %v1343_v7, %v2797_v36  ;;  %v49_v52 = vld [vmem:[%s1195_s21 + $0x110] sm:$0xff]  ;;  %v2801_v44 = vld [vmem:[#allocation23_spill] sm:$0xff] }
  0xc7   : > { %1077 = vst [vmem:[%s1435_s25 + $0x68] sm:$0xff] %v1059_v20  ;;  %v920_v62 = vadd.f32 %v904_v25, %v884_v40  ;;  %v69_v57 = vmul.f32 %v1156_v13, %v2798_v6  ;;  %v89_v50 = vmul.f32 %v1159_v14, %v2799_v1  ;;  %v125_v5 = vmul.f32 %v1162_v15, %v2800_v54  ;;  %v2802_v28 = vld [vmem:[#allocation28_spill] sm:$0xff] }
  0xc8   : > { %v416_v61 = vadd.f32 %v400_v4, %v380_v48  ;;  %v620_v9 = vadd.f32 %v604_v0, %v584_v51  ;;  %v788_v11 = vadd.f32 %v772_v58, %v752_v39  ;;  %v1012_v63 = vmul.f32 %v1145_v3, %v864_v37  ;;  %v253_v37 = vld [vmem:[%s1195_s21 + $0x111] sm:$0xff]  ;;  %v2806_v39 = vld [vmem:[#allocation31_spill] sm:$0xff] }
  0xc9   : > { %v956_v12 = vadd.f32 %v940_v30, %v920_v62  ;;  %v105_v2 = vadd.f32 %v89_v50, %v69_v57  ;;  %v273_v46 = vmul.f32 %v1174_v19, %v2801_v44  ;;  %v293_v13 = vmul.f32 %v2646_v47, %v2802_v28  ;;  %v2803_v47 = vld [vmem:[#allocation36_spill] sm:$0xff]  ;;  %v2808_v62 = vld [vmem:[#allocation22_spill] sm:$0xff]  ;;  %v2809_v57 = vld [vmem:[#allocation35_spill] sm:$0xff] }
  0xca   : > { %v824_v40 = vadd.f32 %v808_v45, %v788_v11  ;;  %v161_v14 = vmul.f32 %v1168_v17, %v2208_v38  ;;  %v329_v15 = vmul.f32 %v1181_v21, %v2775_v41  ;;  %v636_v48 = vadd.f32 %v620_v9, %v212_v55  ;;  %v2804_v25 = vld [vmem:[#allocation20_spill] sm:$0xff] }
  0xcb   : > { %v992_v4 = vadd.f32 %v976_v59, %v956_v12  ;;  %v141_v0 = vadd.f32 %v125_v5, %v105_v2  ;;  %v309_v58 = vadd.f32 %v293_v13, %v273_v46  ;;  %v197_v20 = vmul.f32 %v1171_v18, %v49_v52  ;;  %v457_v55 = vld [vmem:[%s1195_s21 + $0x112] sm:$0xff]  ;;  %v2805_v18 = vld [vmem:[#allocation30_spill] sm:$0xff]  ;;  %v2811_v5 = vld [vmem:[#allocation39_spill] sm:$0xff] }
  0xcc   : > { %v477_v19 = vmul.f32 %v1190_v24, %v2743_v53  ;;  %v497_v60 = vmul.f32 %v2611_v43, %v2803_v47  ;;  %v533_v17 = vmul.f32 %v1201_v26, %v2804_v25  ;;  %v840_v38 = vadd.f32 %v824_v40, %v416_v61  ;;  %v2807_v53 = vld [vmem:[#allocation37_spill] sm:$0xff] }
  0xcd   : > { %v1028_v10 = vadd.f32 %v1012_v63, %v992_v4  ;;  %v345_v21 = vadd.f32 %v329_v15, %v309_v58  ;;  %v365_v41 = vmul.f32 %v1184_v22, %v2221_v16  ;;  %v569_v51 = vmul.f32 %v1204_v27, %v2805_v18  ;;  %v661_v59 = vld [vmem:[%s1195_s21 + $0x113] sm:$0xff]  ;;  %v2812_v63 = vld [vmem:[#allocation27_spill] sm:$0xff] }
  0xce   : > { %v513_v30 = vadd.f32 %v497_v60, %v477_v19  ;;  %v681_v24 = vmul.f32 %v1218_v32, %v2806_v39  ;;  %v701_v43 = vmul.f32 %v1221_v33, %v2807_v53  ;;  %v177_v26 = vadd.f32 %v161_v14, %v141_v0  ;;  %v2810_v33 = vld [vmem:[#allocation38_spill] sm:$0xff] }
  0xcf   : > { %v1044_v45 = vadd.f32 %v1028_v10, %v636_v48  ;;  %v401_v36 = vmul.f32 %v1187_v23, %v253_v37  ;;  %v737_v22 = vmul.f32 %v1224_v34, %v2808_v62  ;;  %v605_v6 = vmul.f32 %v2578_v31, %v457_v55  ;;  %v865_v34 = vld [vmem:[%s1195_s21 + $0x114] sm:$0xff] }
  0xd0   : > { %v549_v16 = vadd.f32 %v533_v17, %v513_v30  ;;  %v717_v27 = vadd.f32 %v701_v43, %v681_v24  ;;  %v773_v32 = vmul.f32 %v1227_v35, %v2809_v57  ;;  %v381_v50 = vadd.f32 %v365_v41, %v345_v21 }
  0xd1   : > { %v1060_v1 = vadd.f32 %v1044_v45, %v840_v38  ;;  %v885_v54 = vmul.f32 %v1259_v49, %v2810_v33  ;;  %v905_v23 = vmul.f32 %v1273_v56, %v2811_v5  ;;  %v809_v11 = vmul.f32 %v1242_v42, %v661_v59 }
  0xd2   : > { %v585_v61 = vadd.f32 %v569_v51, %v549_v16  ;;  %v753_v9 = vadd.f32 %v737_v22, %v717_v27  ;;  %v941_v31 = vmul.f32 %v1295_v8, %v2812_v63  ;;  %v213_v12 = vadd.f32 %v197_v20, %v177_v26 }
  0xd3   : > { %1078 = vst [vmem:[%s1435_s25 + $0x70] sm:$0xff] %v1060_v1  ;;  %v921_v35 = vadd.f32 %v905_v23, %v885_v54  ;;  %v977_v52 = vmul.f32 %v1343_v7, %v2255_v29  ;;  %v417_v44 = vadd.f32 %v401_v36, %v381_v50  ;;  %v1013_v56 = vmul.f32 %v1145_v3, %v865_v34 }
  0xd4   : > { %v621_v2 = vadd.f32 %v605_v6, %v585_v61  ;;  %v789_v49 = vadd.f32 %v773_v32, %v753_v9 }
  0xd5   : > { %v957_v46 = vadd.f32 %v941_v31, %v921_v35 }
  0xd6   : > { %v825_v28 = vadd.f32 %v809_v11, %v789_v49  ;;  %v637_v13 = vadd.f32 %v621_v2, %v213_v12 }
  0xd7   : > { %v993_v42 = vadd.f32 %v977_v52, %v957_v46 }
  0xd8   : > { %v841_v40 = vadd.f32 %v825_v28, %v417_v44 }
  0xd9   : > { %v1029_v14 = vadd.f32 %v1013_v56, %v993_v42  ;;  %19 = sbr.rel (!%p17_p1) target bundleno = 4 (0x4), region = 37 }
  0xdb   : > { %v1045_v15 = vadd.f32 %v1029_v14, %v637_v13 }
  0xdd   : > { %v1061_v8 = vadd.f32 %v1045_v15, %v841_v40 }
  0xdf   : > { %1079 = vst [vmem:[%s1435_s25 + $0x78] sm:$0xff] %v1061_v8 }

</bundles_post_ra>
